<compile_context>
chip_gen: v7x
topology: tpu7x:2x2x1
jax: 0.10.0
libtpu: 0.0.40
codegen_flags: <defaults>
</compile_context>

<pallas_src>
from functools import partial

import jax
import jax.numpy as jnp
from jax.experimental import pallas as pl
from jax.experimental.pallas import tpu as pltpu


# ---------------------------------------------------------------------------
# Attention kernel: one (batch element, token tile) per grid step.
# ---------------------------------------------------------------------------
def cross_attention_kernel(x_ref, wq_ref, kvt_ref, o_ref, *, num_heads, chunk):
    # x_ref:   (1, C, THW)  tokens, channels-major (native NCHW layout)
    # wq_ref:  (C, C)       bf16 to_q weight (out, in); attention scale folded in
    # kvt_ref: (2C, B)      f32 keys/values, channels-major (keys span the batch)
    # o_ref:   (1, THW, C)  lane-dense output tile
    c = x_ref.shape[1]
    thw = x_ref.shape[2]
    dh = c // num_heads
    nkeys = kvt_ref.shape[-1]                      # = B

    # Grid-step-invariant loads, hoisted above the chunk loop.
    wq = wq_ref[...]                               # (C, C) bf16
    kvt = kvt_ref[...]                             # (2C, B) f32
    k_t, v_t = kvt[:c], kvt[c:]                    # (C, B) each

    def per_head_sum(z, cw):                       # (C, cw) -> (H, cw)
        return z.reshape(num_heads, dh, cw).sum(axis=1)

    def per_head_expand(a, cw):                    # (H, cw) -> (C, cw)
        return jnp.broadcast_to(a[:, None, :], (num_heads, dh, cw)).reshape(c, cw)

    # Chunk the VPU/softmax/store pipeline over the token (lane) axis so the
    # per-chunk working set (a handful of (C, chunk) f32 arrays) stays close to
    # the register file instead of round-tripping through VMEM.  Static slices
    # (Python loop over concrete offsets) avoid dynamic lane addressing.
    for ci in range(thw // chunk):
        s0 = ci * chunk
        x_c = x_ref[0, :, s0:s0 + chunk].astype(jnp.bfloat16)        # (C, chunk)

        # q^T = (scale * Wq) @ x_chunk on the MXU, f32 accumulation.  256-lane
        # chunks keep the MXU fully fed while q never materializes full-width.
        qt = jnp.dot(wq, x_c, preferred_element_type=jnp.float32)    # (C, chunk)

        # Scores over the (tiny, = batch) key axis: VPU broadcast-multiply +
        # sublane-block reduce.  Cost is O(B*C*chunk) VALU and the loop unrolls
        # B times -- right for small B; switch to a per-head MXU einsum /
        # online-softmax key loop if B grows beyond ~8.
        scores = [per_head_sum(qt * k_t[:, j:j + 1], chunk) for j in range(nkeys)]

        # Numerically-stable softmax over the key axis, kept in f32.
        m = scores[0]
        for s in scores[1:]:
            m = jnp.maximum(m, s)
        exps = [jnp.exp(s - m) for s in scores]                      # (H, chunk)
        denom = exps[0]
        for e_ in exps[1:]:
            denom = denom + e_
        inv_denom = 1.0 / denom        # exact; (H, chunk) is only a few vregs

        # Normalize at (H, chunk) granularity *before* the sublane expand, then
        # accumulate the value-weighted sum directly (no separate full-size
        # normalization pass over (C, chunk)).
        acc = v_t[:, 0:1] * per_head_expand(exps[0] * inv_denom, chunk)
        for j in range(1, nkeys):
            acc = acc + v_t[:, j:j + 1] * per_head_expand(exps[j] * inv_denom, chunk)

        # One on-chip transpose per chunk, then a lane-dense (chunk, C) store.
        o_ref[0, s0:s0 + chunk, :] = acc.T.astype(o_ref.dtype)


# ---------------------------------------------------------------------------
# Wrapper
# ---------------------------------------------------------------------------
def cross_attention(x, embedding, wq, wkv, *, num_heads=8, block_hw=None,
                    use_broadcast_fast_path=True):
    """x: (B, C, H, W) NCHW; embedding: (1, E) or (B, E); wq: (C, C); wkv: (2C, E)."""
    b, c, h, w = x.shape
    hw = h * w
    e = embedding.shape[-1]
    assert c % num_heads == 0
    scale = (c // num_heads) ** (-0.5)

    # ---- kv projection: ~1.5 MFLOP -> plain XLA GEMM, no extra Pallas launch.
    wkv_f32 = wkv.astype(jnp.float32)
    emb = embedding.astype(jnp.float32)
    if embedding.shape[0] == 1:
        kv_col = wkv_f32 @ emb[0]                                  # (2C,)
        if use_broadcast_fast_path:
            # All B keys/values are identical (single embedding expanded), so
            # the softmax is exactly uniform and the attention output is the v
            # vector broadcast over every token, independent of x.  The final
            # PyTorch `.view(b, C, h, w)` of the contiguous (b, HW, C) tensor
            # is a raw row-major reinterpretation, reproduced by reshape().
            v_col = kv_col[c:]
            out = jnp.broadcast_to(v_col[None, None, :], (b, hw, c))
            return out.astype(x.dtype).reshape(b, c, h, w)
        kvt = jnp.broadcast_to(kv_col[:, None], (2 * c, b))        # (2C, B)
    else:
        kvt = wkv_f32 @ jnp.broadcast_to(emb, (b, e)).T            # (2C, B)

    # ---- wrapper-side prep (views / tiny ops only; no extra HBM pass over x).
    x_flat = x.reshape(b, c, hw)                                   # (B, C, HW) view
    wq_scaled = (wq * scale).astype(jnp.bfloat16)                  # fold scale in

    # ---- token-axis tiling -------------------------------------------------
    if block_hw is None:
        if hw <= 1024:
            block_hw = hw
        elif hw % 1024 == 0:
            block_hw = 1024
        elif hw % 512 == 0:
            block_hw = 512
        else:
            block_hw = hw
        # v7x has 2 TensorCores: make sure the parallel grid has >= 2 steps.
        if b * (hw // block_hw) < 2 and block_hw % 256 == 0:
            block_hw //= 2
    assert hw % block_hw == 0

    # Inner lane-chunk for the post-matmul pipeline.
    if block_hw % 256 == 0:
        chunk = 256
    elif block_hw % 128 == 0:
        chunk = 128
    else:
        chunk = block_hw

    # VMEM budget: double-buffered x/out tiles + resident weights/kv +
    # ~10 chunk-sized f32 intermediates; 2x headroom, capped for v7x (64 MiB).
    budget = (2 * c * block_hw * x.dtype.itemsize                  # x tiles
              + 2 * block_hw * c * x.dtype.itemsize                # out tiles
              + 2 * c * c * 2                                      # Wq (bf16)
              + 2 * 2 * c * 128 * 4                                # kv^T (lane-padded)
              + 10 * c * chunk * 4)                                # chunk intermediates
    vmem_limit = int(min(max(2 * budget, 16 * 1024 * 1024), 64 * 1024 * 1024))

    out = pl.pallas_call(
        partial(cross_attention_kernel, num_heads=num_heads, chunk=chunk),
        out_shape=jax.ShapeDtypeStruct((b, hw, c), x.dtype),
        grid_spec=pltpu.PrefetchScalarGridSpec(
            num_scalar_prefetch=0,
            grid=(b, hw // block_hw),
            in_specs=[
                pl.BlockSpec((1, c, block_hw), lambda i, t: (i, 0, t)),  # x tile
                pl.BlockSpec((c, c), lambda i, t: (0, 0)),               # Wq (resident)
                pl.BlockSpec((2 * c, b), lambda i, t: (0, 0)),           # kv^T (resident)
            ],
            out_specs=pl.BlockSpec((1, block_hw, c), lambda i, t: (i, t, 0)),
        ),
        compiler_params=pltpu.CompilerParams(
            dimension_semantics=("parallel", "parallel"),
            vmem_limit_bytes=vmem_limit),
    )(x_flat, wq_scaled, kvt)

    # PyTorch: out.view(b, hw, C) then .view(b, C, h, w) == raw row-major reshape.
    return out.reshape(b, c, h, w)


# ---------------------------------------------------------------------------
# Pure-JAX reference mirroring the PyTorch forward exactly (all f32).
# ---------------------------------------------------------------------------
def cross_attention_ref(x, embedding, wq, wkv, *, num_heads=8):
    b, c, hh, ww = x.shape
    dh = c // num_heads
    scale = dh ** (-0.5)
    xf = jnp.transpose(x.reshape(b, c, hh * ww), (0, 2, 1))        # (b, hw, c)
    q = xf @ wq.T                                                  # (b, hw, c)
    q = q.reshape(b, hh * ww, num_heads, dh).transpose(0, 2, 1, 3) # (b, H, hw, dh)
    kv = jnp.broadcast_to(embedding, (b, embedding.shape[-1])) @ wkv.T
    kv = kv.reshape(b, 2, num_heads, dh).transpose(1, 2, 0, 3)     # (2, H, b, dh)
    k, v = kv[0], kv[1]
    q = q * scale
    attn = jnp.einsum('bhpd,hjd->bhpj', q, k)
    attn = jax.nn.softmax(attn, axis=-1)
    out = jnp.einsum('bhpj,hjd->bhpd', attn, v)
    out = out.transpose(0, 2, 1, 3).reshape(b, hh * ww, c)
    return out.reshape(b, c, hh, ww)


if __name__ == "__main__":
    # Module-consistent shapes (features_dim=256, embed_dim=1536 as in the spec).
    batch = 2
    features_dim = 256
    embed_dim = 1536
    num_heads = 8
    spatial = 16

    key = jax.random.PRNGKey(0)
    k_x, k_e1, k_eb, k_q, k_kv = jax.random.split(key, 5)
    x = jax.random.normal(k_x, (batch, features_dim, spatial, spatial),
                          dtype=jnp.float32)
    embedding1 = jax.random.normal(k_e1, (1, embed_dim), dtype=jnp.float32)
    embedding_b = jax.random.normal(k_eb, (batch, embed_dim), dtype=jnp.float32)
    # nn.Linear weights are (out_features, in_features); deterministic init.
    wq = jax.random.normal(k_q, (features_dim, features_dim),
                           dtype=jnp.float32) * 0.02
    wkv = jax.random.normal(k_kv, (2 * features_dim, embed_dim),
                            dtype=jnp.float32) * 0.02

    # 1) General Pallas attention path with per-batch distinct keys
    #    (non-trivial softmax exercises the full kernel).
    out_g = jax.block_until_ready(
        cross_attention(x, embedding_b, wq, wkv, num_heads=num_heads))
    ref_g = cross_attention_ref(x, embedding_b, wq, wkv, num_heads=num_heads)
    assert out_g.shape == (batch, features_dim, spatial, spatial)
    assert jnp.allclose(out_g, ref_g, rtol=1e-2, atol=1e-2), \
        f"general path max err {jnp.max(jnp.abs(out_g - ref_g))}"

    # 2) Module's broadcast-embedding config through the general kernel
    #    (fast path disabled).
    out_k = jax.block_until_ready(
        cross_attention(x, embedding1, wq, wkv, num_heads=num_heads,
                        use_broadcast_fast_path=False))
    ref_b = cross_attention_ref(x, embedding1, wq, wkv, num_heads=num_heads)
    assert jnp.allclose(out_k, ref_b, rtol=1e-2, atol=1e-2), \
        f"broadcast(kernel) max err {jnp.max(jnp.abs(out_k - ref_b))}"

    # 3) Fast path for the broadcast-embedding case (exact up to f32 GEMM order).
    out_f = jax.block_until_ready(
        cross_attention(x, embedding1, wq, wkv, num_heads=num_heads))
    assert out_f.shape == (batch, features_dim, spatial, spatial)
    assert jnp.allclose(out_f, ref_b, rtol=1e-3, atol=1e-3), \
        f"fast path max err {jnp.max(jnp.abs(out_f - ref_b))}"

    print("KERNEL_OK")
</pallas_src>

<mosaic_0001>
module attributes {stable_mosaic.version = 11 : i64} {
  func.func @cross_attention_kernel(%arg0: i32, %arg1: i32, %arg2: memref<1x256x256xf32, #tpu.memory_space<vmem>>, %arg3: memref<256x256xbf16, #tpu.memory_space<vmem>>, %arg4: memref<512x2xf32, #tpu.memory_space<vmem>>, %arg5: memref<1x256x256xf32, #tpu.memory_space<vmem>>) attributes {dimension_semantics = [#tpu.dimension_semantics<parallel>, #tpu.dimension_semantics<parallel>], iteration_bounds = array<i64: 2, 1>, scalar_prefetch = 0 : i64, scratch_operands = 0 : i64, tpu.core_type = #tpu.core_type<tc>, window_params = [{transform_indices = @transform_0, window_bounds = array<i64: 1, 256, 256>}, {pipeline_mode = #tpu.pipeline_mode<synchronous>, transform_indices = @transform_1, window_bounds = array<i64: 256, 256>}, {pipeline_mode = #tpu.pipeline_mode<synchronous>, transform_indices = @transform_2, window_bounds = array<i64: 512, 2>}, {transform_indices = @transform_3, window_bounds = array<i64: 1, 256, 256>}]} {
    %c0 = arith.constant 0 : index
    %c0_0 = arith.constant 0 : index
    %0 = vector.load %arg3[%c0, %c0_0] : memref<256x256xbf16, #tpu.memory_space<vmem>>, vector<256x256xbf16>
    %c0_1 = arith.constant 0 : index
    %c0_2 = arith.constant 0 : index
    %1 = vector.load %arg4[%c0_1, %c0_2] : memref<512x2xf32, #tpu.memory_space<vmem>>, vector<512x2xf32>
    %2 = vector.extract_strided_slice %1 {offsets = [0, 0], sizes = [256, 2], strides = [1, 1]} : vector<512x2xf32> to vector<256x2xf32>
    %3 = vector.extract_strided_slice %1 {offsets = [256, 0], sizes = [256, 2], strides = [1, 1]} : vector<512x2xf32> to vector<256x2xf32>
    %c0_3 = arith.constant 0 : index
    %c0_4 = arith.constant 0 : index
    %c0_5 = arith.constant 0 : index
    %4 = vector.load %arg2[%c0_3, %c0_4, %c0_5] : memref<1x256x256xf32, #tpu.memory_space<vmem>>, vector<1x256x256xf32>
    %5 = vector.shape_cast %4 : vector<1x256x256xf32> to vector<256x256xf32>
    %6 = arith.truncf %5 : vector<256x256xf32> to vector<256x256xbf16>
    %cst = arith.constant dense<0.000000e+00> : vector<256x256xf32>
    %7 = tpu.matmul %0, %6, %cst {dimension_numbers = #tpu.dot_dimension_numbers<[1], [0], [0], [1], [0, 0, 1, 1], [], []>} : vector<256x256xbf16>, vector<256x256xbf16>, vector<256x256xf32> -> vector<256x256xf32>
    %8 = vector.extract_strided_slice %2 {offsets = [0, 0], sizes = [256, 1], strides = [1, 1]} : vector<256x2xf32> to vector<256x1xf32>
    %9 = vector.broadcast %8 : vector<256x1xf32> to vector<256x256xf32>
    %10 = arith.mulf %7, %9 : vector<256x256xf32>
    %11 = vector.shape_cast %10 : vector<256x256xf32> to vector<8x32x256xf32>
    %cst_6 = arith.constant dense<0.000000e+00> : vector<8x256xf32>
    %12 = vector.multi_reduction <add>, %11, %cst_6 [1] : vector<8x32x256xf32> to vector<8x256xf32>
    %13 = vector.extract_strided_slice %2 {offsets = [0, 1], sizes = [256, 1], strides = [1, 1]} : vector<256x2xf32> to vector<256x1xf32>
    %14 = vector.broadcast %13 : vector<256x1xf32> to vector<256x256xf32>
    %15 = arith.mulf %7, %14 : vector<256x256xf32>
    %16 = vector.shape_cast %15 : vector<256x256xf32> to vector<8x32x256xf32>
    %cst_7 = arith.constant dense<0.000000e+00> : vector<8x256xf32>
    %17 = vector.multi_reduction <add>, %16, %cst_7 [1] : vector<8x32x256xf32> to vector<8x256xf32>
    %18 = arith.maximumf %12, %17 : vector<8x256xf32>
    %19 = arith.subf %12, %18 : vector<8x256xf32>
    %20 = math.exp %19 : vector<8x256xf32>
    %21 = arith.subf %17, %18 : vector<8x256xf32>
    %22 = math.exp %21 : vector<8x256xf32>
    %23 = arith.addf %20, %22 : vector<8x256xf32>
    %cst_8 = arith.constant 1.000000e+00 : f32
    %24 = vector.broadcast %cst_8 : f32 to vector<8x256xf32>
    %25 = arith.divf %24, %23 : vector<8x256xf32>
    %26 = vector.extract_strided_slice %3 {offsets = [0, 0], sizes = [256, 1], strides = [1, 1]} : vector<256x2xf32> to vector<256x1xf32>
    %27 = arith.mulf %20, %25 : vector<8x256xf32>
    %28 = vector.shape_cast %27 : vector<8x256xf32> to vector<8x1x256xf32>
    %29 = vector.shape_cast %28 : vector<8x1x256xf32> to vector<8x1x256xf32>
    %30 = vector.broadcast %29 : vector<8x1x256xf32> to vector<8x32x256xf32>
    %31 = vector.shape_cast %30 : vector<8x32x256xf32> to vector<256x256xf32>
    %32 = vector.broadcast %26 : vector<256x1xf32> to vector<256x256xf32>
    %33 = arith.mulf %32, %31 : vector<256x256xf32>
    %34 = vector.extract_strided_slice %3 {offsets = [0, 1], sizes = [256, 1], strides = [1, 1]} : vector<256x2xf32> to vector<256x1xf32>
    %35 = arith.mulf %22, %25 : vector<8x256xf32>
    %36 = vector.shape_cast %35 : vector<8x256xf32> to vector<8x1x256xf32>
    %37 = vector.shape_cast %36 : vector<8x1x256xf32> to vector<8x1x256xf32>
    %38 = vector.broadcast %37 : vector<8x1x256xf32> to vector<8x32x256xf32>
    %39 = vector.shape_cast %38 : vector<8x32x256xf32> to vector<256x256xf32>
    %40 = vector.broadcast %34 : vector<256x1xf32> to vector<256x256xf32>
    %41 = arith.mulf %40, %39 : vector<256x256xf32>
    %42 = arith.addf %33, %41 : vector<256x256xf32>
    %43 = tpu.transpose %42, [1, 0] : vector<256x256xf32> -> vector<256x256xf32>
    %c0_9 = arith.constant 0 : index
    %c0_10 = arith.constant 0 : index
    %c0_11 = arith.constant 0 : index
    %44 = vector.load %arg5[%c0_9, %c0_10, %c0_11] : memref<1x256x256xf32, #tpu.memory_space<vmem>>, vector<1x256x256xf32>
    %45 = vector.shape_cast %44 : vector<1x256x256xf32> to vector<256x256xf32>
    %46 = vector.shape_cast %43 : vector<256x256xf32> to vector<1x256x256xf32>
    tpu.vector_store %arg5[%c0_9, %c0_10, %c0_11], %46 {strides = array<i32>} : memref<1x256x256xf32, #tpu.memory_space<vmem>>, vector<1x256x256xf32>,
    return
  }
  func.func @transform_0(%arg0: i32, %arg1: i32) -> (i32, i32, i32) {
    %c0_i32 = arith.constant 0 : i32
    %c0_i32_0 = arith.constant 0 : i32
    return %arg0, %c0_i32, %arg1 : i32, i32, i32
  }
  func.func @transform_1(%arg0: i32, %arg1: i32) -> (i32, i32) {
    %c0_i32 = arith.constant 0 : i32
    %c0_i32_0 = arith.constant 0 : i32
    %c0_i32_1 = arith.constant 0 : i32
    return %c0_i32, %c0_i32_0 : i32, i32
  }
  func.func @transform_2(%arg0: i32, %arg1: i32) -> (i32, i32) {
    %c0_i32 = arith.constant 0 : i32
    %c0_i32_0 = arith.constant 0 : i32
    %c0_i32_1 = arith.constant 0 : i32
    return %c0_i32, %c0_i32_0 : i32, i32
  }
  func.func @transform_3(%arg0: i32, %arg1: i32) -> (i32, i32, i32) {
    %c0_i32 = arith.constant 0 : i32
    %c0_i32_0 = arith.constant 0 : i32
    return %arg0, %arg1, %c0_i32 : i32, i32, i32
  }
}

</mosaic_0001>

<bundles_post_ra>
// kernel: tpu_custom_call.1
= control target key start
LH: loop header
LB: loop body
LE: loop exit
PB: predicated region body
PF: predicated region fallthrough
CT: control target
= control target key end

     0   :  { %8 = vsyncpa [#allocation3], 0  ;;  %s4662_s0 = inlined_call_operand.hbm [shape: f32[2,256,256], index: 0, kind: input, shape index: {}]   ;;  %s4663_s1 = inlined_call_operand.vmem [shape: bf16[256,256], index: 1, kind: input, shape index: {}]   ;;  %s4664_s2 = inlined_call_operand.vmem [shape: f32[512,2], index: 2, kind: input, shape index: {}]   ;;  %s4665_s3 = inlined_call_operand.hbm [shape: f32[2,256,256], index: 3, kind: output, shape index: {}]  }
   0x1   :  { %10 = vsyncpa [#allocation3 + $0x1], 0 }
   0x2   :  { %11 = vsyncpa [#allocation4], 0 }
   0x3   :  { %13 = vsyncpa [#allocation4 + $0x1], 0  ;;  %s2867_s12 = smov 0   ;;  %s2869_s13 = smov 0  }
   0x4   :  { %s2871_s14 = smov 0   ;;  %s2873_s15 = smov 0  }
   0x5   :  { %s2875_s16 = smov 0   ;;  %s2877_s17 = smov 0  }
   0x6 LB: > { %s2426_s18 = sadd.s32 4294967295, %s2837_s17   ;;  %s2427_s19 = sadd.s32 4294967294, %s2837_s17   ;;  %s2837_s17 = sphi %s2877_s17, %s19_s17   ;;  %s2833_s16 = sphi %s2875_s16, %s4880_s16   ;;  %s2829_s15 = sphi %s2873_s15, %s4879_s15   ;;  %s2825_s14 = sphi %s2871_s14, %s4878_s14   ;;  %s2821_s13 = sphi %s2869_s13, %s4877_s13   ;;  %s2817_s12 = sphi %s2867_s12, %s4876_s12  }
   0x7   : > { %s31_s20 = sadd.s32 1, %s2833_s16  ;;  %s40_s21 = sadd.s32 1, %s2825_s14 }
   0x8   : > { %p33_p0 = scmp.ge.s32.totalorder %s31_s20, 2  ;;  %p47_p1 = scmp.ne.s32.totalorder %s2825_s14, %s2821_s13 }
   0x9   : > { %p48_p2 = scmp.eq.s32.totalorder %s2837_s17, 0  ;;  %p53_p3 = scmp.ne.s32.totalorder %s2821_s13, %s2817_s12 }
   0xa   : > { %s4882_s20 = smov (%p33_p0, %s31_s20), 0  ;;  %p54_p5 = scmp.eq.s32.totalorder %s2426_s18, 0 }
   0xb   : > { %p2908_p4 = por %p48_p2, %p47_p1  ;;  %s35_s23 = ssub.s32 %s2833_s16, %s4882_s20 }
   0xc   : > { %p121_p6 = scmp.eq.s32.totalorder %s2426_s18, 1  ;;  %p38_p7 = scmp.eq.s32.totalorder %s35_s23, 0 }
   0xd   : > { %p2914_p8 = por %p54_p5, %p53_p3  ;;  %p127_p10 = scmp.eq.s32.totalorder %s2427_s19, 1 }
   0xe   : > { %p2918_p9 = por %p121_p6, %p47_p1  ;;  %p2519_p13 = scmp.lt.s32.totalorder %s2837_s17, 2 }
   0xf   : > { %s2923_s26 = scalar_select %p38_p7, %s2825_s14, %s40_s21  }
  0x10   : > { %s4734_s25 = scalar_select %p2918_p9, 1, 0 }
  0x11   : > { %p2925_p11 = por %p127_p10, %p53_p3  ;;  %s153_s28 = sand.u32 1, %s2825_s14  }
  0x12   : > { %s2430_s29 = sshll.u32 %s153_s28, 9  ;;  %s2473_s30 = sshll.u32 %s2833_s16, 13 }
  0x13   : > { %s4735_s27 = scalar_select %p2925_p11, 1, 0 }
  0x14   : > { %s2936_s6 = scalar_lea.hbm %s4662_s0, %s2473_s30  ;;  %s157_s7 = scalar_lea.vmem [#allocation2], %s2430_s29 }
  0x15   : > { %s166_s8 = sshll.u32 %s157_s7, 4  ;;  %p2942_p0 = pnand %p2519_p13, %p2908_p4  ;;  %s2938_s8 = int_to_ptr.vmem [resolvable:$true] %s166_s8 }
  0x16   : > { %s2947_s10 = scalar_lea.sflag [#allocation3], %s153_s28  ;;  %s2725_s11 = scalar_lea.hbm %s2936_s6, 8192 }
  0x17   : > { %p2726_p2 = scmp.ne.s32.totalorder %s2936_s6, %s2725_s11  ;;  %p2727_p3 = pneg %p2942_p0 }
  0x18   : > { %s2730_s21 = scalar_lea.hbm %s4662_s0, 16384  ;;  %p2731_p4 = scmp.lt.u32.totalorder %s2936_s6, %s4662_s0 }
  0x19   : > { %p2728_p5 = pnand %p2727_p3, %p2726_p2  ;;  %p2732_p7 = scmp.lt.u32.totalorder %s2730_s21, %s2725_s11 }
  0x1a   : > { %p2734_p13 = scmp.lt.u32.totalorder %s2725_s11, %s2936_s6 }
  0x1b   : > { %p2729_p6 = pneg %p2728_p5  ;;  %p2733_p10 = por %p2732_p7, %p2731_p4 }
  0x1d   : > { %p2735_p12 = por %p2734_p13, %p2733_p10 }
  0x1f   : > { %p2736_p1 = pnand %p2735_p12, %p2729_p6 }
  0x21   : > { %2739 = shalt.err (!%p2736_p1)
}
  0x22   : > { %s2740_s28 = scalar_lea.vmem %s2938_s8, 8192  ;;  %s2839_s29 = smov [#allocation2]  }
  0x23   : > { %p2741_p2 = scmp.ne.s32.totalorder %s2938_s8, %s2740_s28  ;;  %s2745_s30 = sshll.u32 %s2839_s29, 4  ;;  %s2746_s30 = int_to_ptr.vmem [resolvable:$false] %s2745_s30 }
  0x24   : > { %s2747_s4 = scalar_lea.vmem %s2746_s30, 16384  ;;  %p2748_p9 = scmp.lt.s32.totalorder %s2938_s8, %s2746_s30 }
  0x25   : > { %p2743_p5 = pnand %p2741_p2, %p2727_p3  ;;  %p2749_p4 = scmp.lt.s32.totalorder %s2747_s4, %s2740_s28 }
  0x27   : > { %p2744_p11 = pneg %p2743_p5  ;;  %p2750_p7 = por %p2749_p4, %p2748_p9 }
  0x29   : > { %p2751_p10 = pnand %p2750_p7, %p2744_p11 }
  0x2b   : > { %2754 = shalt.err (!%p2751_p10)
}
  0x2c   : > { %s2840_s5 = smov 256   ;;  %s2841_s7 = smov 16  }
  0x2d   : > { %2514 = dma.hbm_to_vmem [thread:$0]  (!%p2942_p0), %s2936_s6, 8192, %s2938_s8, %s2947_s10, %s2840_s5, %s2840_s5, %s2841_s7  }
  0x2e   : > { %p174_p12 = scmp.lt.s32.totalorder %s2837_s17, 3  ;;  %p4737_p1 = scmp.ge.s32.totalorder %s2837_s17, 1 }
  0x30   : > { %p175_p3 = pnand %p4737_p1, %p174_p12 }
  0x32   : > { %178 = sbr.rel (%p175_p3) target bundleno = 754 (0x2f2), region = 32 }
  0x39   : > { %s2979_s11 = sand.u32 1, %s2821_s13  }
  0x3a   : > { %s2434_s18 = sshll.u32 %s2979_s11, 9  ;;  %s181_s19 = scalar_lea.sflag [#allocation3], %s2979_s11 }
  0x3b   : > { %s2985_s21 = scalar_lea.vmem [#allocation2], %s2434_s18 }
  0x3c   : > { %2808 = dma.done.wait (%p2914_p8), %s181_s19, 8192  }
  0x3d   : > { %2810 = vsyncadd (%p2914_p8), %s181_s19, 4294959104  ;;  %v2842_v0 = vmov 0   ;;  %v2996_v1 = vld [vmem:[%s4664_s2 + $0x10] sm:$0xff]  ;;  %v3001_v2 = vld [vmem:[%s4664_s2] sm:$0xff]  ;;  %s4540_s8 = scalar_lea.vmem [#allocation5], %s2434_s18  ;;  %s2474_s18 = sshll.u32 %s2829_s15, 13 }
  0x3e   : > { %2576 = vset.pattern.permute.xlu1 %v2842_v0  ;;  %2575 = vset.pattern.permute.xlu0 %v2842_v0  ;;  %v306_v3 = vld [vmem:[%s2985_s21 + $0x8] sm:$0xff]  ;;  %v308_v4 = vld [vmem:[%s2985_s21 + $0x18] sm:$0xff]  ;;  %v305_v5 = vld [vmem:[%s2985_s21] sm:$0xff]  ;;  %s2339_s24 = sshll.u32 %s4540_s8, 4  ;;  %s4610_s22 = scalar_lea.hbm %s4665_s3, %s2474_s18  ;;  %s4612_s24 = int_to_ptr.vmem [resolvable:$true] %s2339_s24 }
  0x3f   : > { %766 = vperm.xlu1 %2576, %v2996_v1   ;;  %756 = vperm.xlu0 %2575, %v3001_v2   ;;  %v307_v6 = vld [vmem:[%s2985_s21 + $0x10] sm:$0xff]  ;;  %v370_v7 = vpack.c.bf16 %v308_v4, %v306_v3  ;;  %v3012_v9 = vld [vmem:[%s4664_s2 + $0x18] sm:$0xff]  ;;  %v3017_v10 = vld [vmem:[%s4664_s2 + $0x8] sm:$0xff]  ;;  %s2323_s23 = scalar_lea.sflag [#allocation4], %s2979_s11  ;;  %s2755_s28 = scalar_lea.vmem %s4612_s24, 8192 }
  0x40   : > { %v369_v8 = vpack.c.bf16 %v307_v6, %v305_v5  ;;  %v310_v11 = vld [vmem:[%s2985_s21 + $0x28] sm:$0xff]  ;;  %v312_v12 = vld [vmem:[%s2985_s21 + $0x38] sm:$0xff]  ;;  %v309_v13 = vld [vmem:[%s2985_s21 + $0x20] sm:$0xff]  ;;  %p2756_p8 = scmp.ne.s32.totalorder %s4612_s24, %s2755_s28  ;;  %p4873_p9 = scmp.ne.s32.totalorder %s4734_s25, 0 }
  0x41   : > { %v311_v14 = vld [vmem:[%s2985_s21 + $0x30] sm:$0xff]  ;;  %561 = vmatprep.subr.bf16.mxu0 %v370_v7  ;;  %2475 = vmatprep.subr.bf16.mxu1 %v370_v7  ;;  %v372_v15 = vpack.c.bf16 %v312_v12, %v310_v11  ;;  %v314_v16 = vld [vmem:[%s2985_s21 + $0x48] sm:$0xff]  ;;  %v316_v18 = vld [vmem:[%s2985_s21 + $0x58] sm:$0xff]  ;;  %s2844_s15 = smov [#allocation5]  }
  0x42   : > { %562 = vmatpush1.bf16.msra.mxu0 %v369_v8  ;;  %2491 = vmatpush1.bf16.msra.mxu1 %v369_v8  ;;  %v371_v17 = vpack.c.bf16 %v311_v14, %v309_v13  ;;  %v313_v19 = vld [vmem:[%s2985_s21 + $0x40] sm:$0xff]  ;;  %v315_v20 = vld [vmem:[%s2985_s21 + $0x50] sm:$0xff]  ;;  %v3032_v21 = vld [vmem:[%s4664_s2 + $0x28] sm:$0xff]  ;;  %v374_v23 = vpack.c.bf16 %v316_v18, %v314_v16  ;;  %p2757_p11 = pnand %p2756_p8, %p4873_p9  ;;  %s2759_s29 = sshll.u32 %s2844_s15, 4  ;;  %s2760_s29 = int_to_ptr.vmem [resolvable:$false] %s2759_s29 }
  0x43   : > { %771 = vperm.xlu1 %2576, %v3012_v9   ;;  %761 = vperm.xlu0 %2575, %v3017_v10   ;;  %v3037_v22 = vld [vmem:[%s4664_s2 + $0x20] sm:$0xff]  ;;  %v318_v24 = vld [vmem:[%s2985_s21 + $0x68] sm:$0xff]  ;;  %v320_v25 = vld [vmem:[%s2985_s21 + $0x78] sm:$0xff]  ;;  %v373_v26 = vpack.c.bf16 %v315_v20, %v313_v19  ;;  %s2761_s30 = scalar_lea.vmem %s2760_s29, 16384  ;;  %p2762_p6 = scmp.lt.s32.totalorder %s4612_s24, %s2760_s29 }
  0x44   : > { %563 = vmatprep.subr.bf16.mxu0 %v372_v15  ;;  %2476 = vmatprep.subr.bf16.mxu1 %v372_v15  ;;  %v317_v27 = vld [vmem:[%s2985_s21 + $0x60] sm:$0xff]  ;;  %v319_v28 = vld [vmem:[%s2985_s21 + $0x70] sm:$0xff]  ;;  %v3048_v29 = vld [vmem:[%s4664_s2 + $0x38] sm:$0xff]  ;;  %v376_v31 = vpack.c.bf16 %v320_v25, %v318_v24  ;;  %p2758_p0 = pneg %p2757_p11  ;;  %p2763_p13 = scmp.lt.s32.totalorder %s2761_s30, %s2755_s28 }
  0x45   : > { %v3053_v30 = vld [vmem:[%s4664_s2 + $0x30] sm:$0xff]  ;;  %v322_v32 = vld [vmem:[%s2985_s21 + $0x88] sm:$0xff]  ;;  %v324_v33 = vld [vmem:[%s2985_s21 + $0x98] sm:$0xff]  ;;  %v375_v34 = vpack.c.bf16 %v319_v28, %v317_v27 }
  0x46   : > { %564 = vmatpush1.bf16.msra.mxu0 %v371_v17  ;;  %2492 = vmatpush1.bf16.msra.mxu1 %v371_v17  ;;  %v321_v35 = vld [vmem:[%s2985_s21 + $0x80] sm:$0xff]  ;;  %v323_v36 = vld [vmem:[%s2985_s21 + $0x90] sm:$0xff]  ;;  %v3064_v37 = vld [vmem:[%s4664_s2 + $0x48] sm:$0xff]  ;;  %v378_v39 = vpack.c.bf16 %v324_v33, %v322_v32  ;;  %p2764_p2 = por %p2763_p13, %p2762_p6 }
  0x47   : > { %781 = vperm.xlu1 %2576, %v3032_v21   ;;  %776 = vperm.xlu0 %2575, %v3037_v22   ;;  %v3069_v38 = vld [vmem:[%s4664_s2 + $0x40] sm:$0xff]  ;;  %v326_v40 = vld [vmem:[%s2985_s21 + $0xa8] sm:$0xff]  ;;  %v328_v41 = vld [vmem:[%s2985_s21 + $0xb8] sm:$0xff]  ;;  %v377_v42 = vpack.c.bf16 %v323_v36, %v321_v35 }
  0x48   : > { %565 = vmatprep.subr.bf16.mxu0 %v374_v23  ;;  %2477 = vmatprep.subr.bf16.mxu1 %v374_v23  ;;  %v325_v43 = vld [vmem:[%s2985_s21 + $0xa0] sm:$0xff]  ;;  %v327_v44 = vld [vmem:[%s2985_s21 + $0xb0] sm:$0xff]  ;;  %v3080_v45 = vld [vmem:[%s4664_s2 + $0x58] sm:$0xff]  ;;  %v380_v47 = vpack.c.bf16 %v328_v41, %v326_v40  ;;  %p2765_p5 = pnand %p2764_p2, %p2758_p0 }
  0x49   : > { %v3085_v46 = vld [vmem:[%s4664_s2 + $0x50] sm:$0xff]  ;;  %v330_v48 = vld [vmem:[%s2985_s21 + $0xc8] sm:$0xff]  ;;  %v332_v49 = vld [vmem:[%s2985_s21 + $0xd8] sm:$0xff]  ;;  %v379_v50 = vpack.c.bf16 %v327_v44, %v325_v43 }
  0x4a   : > { %566 = vmatpush1.bf16.msra.mxu0 %v373_v26  ;;  %2493 = vmatpush1.bf16.msra.mxu1 %v373_v26  ;;  %v329_v51 = vld [vmem:[%s2985_s21 + $0xc0] sm:$0xff]  ;;  %v331_v52 = vld [vmem:[%s2985_s21 + $0xd0] sm:$0xff]  ;;  %v3096_v53 = vld [vmem:[%s4664_s2 + $0x68] sm:$0xff]  ;;  %v382_v55 = vpack.c.bf16 %v332_v49, %v330_v48 }
  0x4b   : > { %791 = vperm.xlu1 %2576, %v3048_v29   ;;  %786 = vperm.xlu0 %2575, %v3053_v30   ;;  %v3101_v54 = vld [vmem:[%s4664_s2 + $0x60] sm:$0xff]  ;;  %v334_v56 = vld [vmem:[%s2985_s21 + $0xe8] sm:$0xff]  ;;  %v336_v57 = vld [vmem:[%s2985_s21 + $0xf8] sm:$0xff]  ;;  %v381_v58 = vpack.c.bf16 %v331_v52, %v329_v51 }
  0x4c   : > { %567 = vmatprep.subr.bf16.mxu0 %v376_v31  ;;  %2478 = vmatprep.subr.bf16.mxu1 %v376_v31  ;;  %v333_v59 = vld [vmem:[%s2985_s21 + $0xe0] sm:$0xff]  ;;  %v335_v60 = vld [vmem:[%s2985_s21 + $0xf0] sm:$0xff]  ;;  %v3112_v61 = vld [vmem:[%s4664_s2 + $0x78] sm:$0xff]  ;;  %v384_v63 = vpack.c.bf16 %v336_v57, %v334_v56 }
  0x4d   : > { %v3117_v62 = vld [vmem:[%s4664_s2 + $0x70] sm:$0xff]  ;;  %v338_v3 = vld [vmem:[%s2985_s21 + $0x108] sm:$0xff]  ;;  %v340_v4 = vld [vmem:[%s2985_s21 + $0x118] sm:$0xff]  ;;  %v383_v5 = vpack.c.bf16 %v335_v60, %v333_v59 }
  0x4e   : > { %568 = vmatpush1.bf16.msra.mxu0 %v375_v34  ;;  %2494 = vmatpush1.bf16.msra.mxu1 %v375_v34  ;;  %v337_v6 = vld [vmem:[%s2985_s21 + $0x100] sm:$0xff]  ;;  %v339_v7 = vld [vmem:[%s2985_s21 + $0x110] sm:$0xff]  ;;  %v3128_v8 = vld [vmem:[%s4664_s2 + $0x88] sm:$0xff]  ;;  %v386_v12 = vpack.c.bf16 %v340_v4, %v338_v3 }
  0x4f   : > { %801 = vperm.xlu1 %2576, %v3064_v37   ;;  %796 = vperm.xlu0 %2575, %v3069_v38   ;;  %v3133_v11 = vld [vmem:[%s4664_s2 + $0x80] sm:$0xff]  ;;  %v342_v13 = vld [vmem:[%s2985_s21 + $0x128] sm:$0xff]  ;;  %v344_v14 = vld [vmem:[%s2985_s21 + $0x138] sm:$0xff]  ;;  %v385_v15 = vpack.c.bf16 %v339_v7, %v337_v6 }
  0x50   : > { %569 = vmatprep.subr.bf16.mxu0 %v378_v39  ;;  %2479 = vmatprep.subr.bf16.mxu1 %v378_v39  ;;  %v3140_v16 = vld [vmem:[%s4664_s2 + $0x98] sm:$0xff]  ;;  %v341_v17 = vld [vmem:[%s2985_s21 + $0x120] sm:$0xff]  ;;  %v343_v19 = vld [vmem:[%s2985_s21 + $0x130] sm:$0xff]  ;;  %v388_v24 = vpack.c.bf16 %v344_v14, %v342_v13 }
  0x51   : > { %v2583_v18 = vld [vmem:[%s4663_s1 + $0x4] ss:$8 sps:$4 sm:$0xff]   ;;  %v3155_v23 = vld [vmem:[%s4664_s2 + $0x90] sm:$0xff]  ;;  %v348_v26 = vld [vmem:[%s2985_s21 + $0x158] sm:$0xff]  ;;  %v387_v27 = vpack.c.bf16 %v343_v19, %v341_v17 }
  0x52   : > { %570 = vmatpush1.bf16.msra.mxu0 %v377_v42  ;;  %2495 = vmatpush1.bf16.msra.mxu1 %v377_v42  ;;  %v2586_v20 = vld [vmem:[%s4663_s1 + $0x84] ss:$8 sps:$4 sm:$0xff]   ;;  %v347_v33 = vld [vmem:[%s2985_s21 + $0x150] sm:$0xff]  ;;  %v352_v36 = vld [vmem:[%s2985_s21 + $0x178] sm:$0xff] }
  0x53   : > { %811 = vperm.xlu1 %2576, %v3080_v45   ;;  %806 = vperm.xlu0 %2575, %v3085_v46   ;;  %v346_v25 = vld [vmem:[%s2985_s21 + $0x148] sm:$0xff]  ;;  %v3169_v31 = vld [vmem:[%s4664_s2 + $0xa0] sm:$0xff]  ;;  %v3178_v40 = vld [vmem:[%s4664_s2 + $0xb8] sm:$0xff] }
  0x54   : > { %571 = vmatprep.subr.bf16.mxu0 %v380_v47  ;;  %2480 = vmatprep.subr.bf16.mxu1 %v380_v47  ;;  %v3162_v28 = vld [vmem:[%s4664_s2 + $0xa8] sm:$0xff]  ;;  %v345_v32 = vld [vmem:[%s2985_s21 + $0x140] sm:$0xff]  ;;  %v390_v34 = vpack.c.bf16 %v348_v26, %v346_v25  ;;  %v351_v42 = vld [vmem:[%s2985_s21 + $0x170] sm:$0xff] }
  0x55   : > { %593 = vmatprep.mubr.bf16.mxu0 %v2583_v18  ;;  %673 = vmatprep.mubr.bf16.mxu1 %v2586_v20  ;;  %v350_v35 = vld [vmem:[%s2985_s21 + $0x168] sm:$0xff]  ;;  %v389_v39 = vpack.c.bf16 %v347_v33, %v345_v32  ;;  %v349_v41 = vld [vmem:[%s2985_s21 + $0x160] sm:$0xff]  ;;  %v3187_v43 = vld [vmem:[%s4664_s2 + $0xb0] sm:$0xff] }
  0x56   : > { %572 = vmatpush1.bf16.msra.mxu0 %v379_v50  ;;  %2496 = vmatpush1.bf16.msra.mxu1 %v379_v50  ;;  %v392_v44 = vpack.c.bf16 %v352_v36, %v350_v35  ;;  %v354_v47 = vld [vmem:[%s2985_s21 + $0x188] sm:$0xff]  ;;  %v356_v48 = vld [vmem:[%s2985_s21 + $0x198] sm:$0xff]  ;;  %v391_v49 = vpack.c.bf16 %v351_v42, %v349_v41  ;;  %v353_v50 = vld [vmem:[%s2985_s21 + $0x180] sm:$0xff] }
  0x57   : > { %821 = vperm.xlu1 %2576, %v3096_v53   ;;  %816 = vperm.xlu0 %2575, %v3101_v54   ;;  %v355_v51 = vld [vmem:[%s2985_s21 + $0x190] sm:$0xff]  ;;  %v3198_v52 = vld [vmem:[%s4664_s2 + $0xc8] sm:$0xff]  ;;  %v394_v56 = vpack.c.bf16 %v356_v48, %v354_v47  ;;  %v357_v60 = vld [vmem:[%s2985_s21 + $0x1a0] sm:$0xff] }
  0x58   : > { %573 = vmatprep.subr.bf16.mxu0 %v382_v55  ;;  %2481 = vmatprep.subr.bf16.mxu1 %v382_v55  ;;  %v3203_v55 = vld [vmem:[%s4664_s2 + $0xc0] sm:$0xff]  ;;  %v358_v57 = vld [vmem:[%s2985_s21 + $0x1a8] sm:$0xff]  ;;  %v393_v59 = vpack.c.bf16 %v355_v51, %v353_v50  ;;  %v3214_v3 = vld [vmem:[%s4664_s2 + $0xd8] sm:$0xff] }
  0x59   : > { %v3219_v4 = vld [vmem:[%s4664_s2 + $0xd0] sm:$0xff]  ;;  %v362_v6 = vld [vmem:[%s2985_s21 + $0x1c8] sm:$0xff]  ;;  %v364_v7 = vld [vmem:[%s2985_s21 + $0x1d8] sm:$0xff] }
  0x5a   : > { %574 = vmatpush1.bf16.msra.mxu0 %v381_v58  ;;  %2497 = vmatpush1.bf16.msra.mxu1 %v381_v58  ;;  %v360_v58 = vld [vmem:[%s2985_s21 + $0x1b8] sm:$0xff]  ;;  %v3228_v13 = vld [vmem:[%s4664_s2 + $0xe8] sm:$0xff]  ;;  %v361_v14 = vld [vmem:[%s2985_s21 + $0x1c0] sm:$0xff]  ;;  %v398_v18 = vpack.c.bf16 %v364_v7, %v362_v6 }
  0x5b   : > { %831 = vperm.xlu1 %2576, %v3112_v61   ;;  %826 = vperm.xlu0 %2575, %v3117_v62   ;;  %v3235_v17 = vld [vmem:[%s4664_s2 + $0xe0] sm:$0xff]  ;;  %v366_v19 = vld [vmem:[%s2985_s21 + $0x1e8] sm:$0xff]  ;;  %v368_v20 = vld [vmem:[%s2985_s21 + $0x1f8] sm:$0xff] }
  0x5c   : > { %575 = vmatprep.subr.bf16.mxu0 %v384_v63  ;;  %2482 = vmatprep.subr.bf16.mxu1 %v384_v63  ;;  %v359_v63 = vld [vmem:[%s2985_s21 + $0x1b0] sm:$0xff]  ;;  %v365_v25 = vld [vmem:[%s2985_s21 + $0x1e0] sm:$0xff]  ;;  %v400_v33 = vpack.c.bf16 %v368_v20, %v366_v19  ;;  %v3258_v35 = vld [vmem:[%s4664_s2 + $0x108] sm:$0xff] }
  0x5d   : > { %v367_v26 = vld [vmem:[%s2985_s21 + $0x1f0] sm:$0xff]  ;;  %v2581_v36 = vld [vmem:[%s4663_s1] ss:$8 sps:$4 sm:$0xff]   ;;  %v2593_v50 = vld [vmem:[%s4663_s1 + $0x24] ss:$8 sps:$4 sm:$0xff]  }
  0x5e   : > { %576 = vmatpush1.bf16.msra.mxu0 %v383_v5  ;;  %2498 = vmatpush1.bf16.msra.mxu1 %v383_v5  ;;  %v396_v5 = vpack.c.bf16 %v360_v58, %v358_v57  ;;  %v3251_v32 = vld [vmem:[%s4664_s2 + $0xf0] sm:$0xff]  ;;  %v3278_v47 = vld [vmem:[%s4664_s2 + $0x120] sm:$0xff] }
  0x5f   : > { %841 = vperm.xlu1 %2576, %v3128_v8   ;;  %836 = vperm.xlu0 %2575, %v3133_v11   ;;  %v2587_v41 = vld [vmem:[%s4663_s1 + $0x14] ss:$8 sps:$4 sm:$0xff]   ;;  %v3304_v51 = vld [vmem:[%s4664_s2 + $0x140] sm:$0xff]  ;;  %v2616_v19 = vld [vmem:[%s4663_s1 + $0xd0] ss:$8 sps:$4 sm:$0xff]  }
  0x60   : > { %577 = vmatprep.subr.bf16.mxu0 %v386_v12  ;;  %2483 = vmatprep.subr.bf16.mxu1 %v386_v12  ;;  %v395_v12 = vpack.c.bf16 %v359_v63, %v357_v60  ;;  %v2589_v42 = vld [vmem:[%s4663_s1 + $0x94] ss:$8 sps:$4 sm:$0xff]   ;;  %v2598_v57 = vld [vmem:[%s4663_s1 + $0xa0] ss:$8 sps:$4 sm:$0xff]   ;;  %v2604_v63 = vld [vmem:[%s4663_s1 + $0xb0] ss:$8 sps:$4 sm:$0xff]  }
  0x61   : > { %v3285_v48 = vld [vmem:[%s4664_s2 + $0x130] sm:$0xff]  ;;  %v3356_v6 = vld [vmem:[%s4664_s2 + $0x180] sm:$0xff] }
  0x62   : > { %578 = vmatpush1.bf16.msra.mxu0 %v385_v15  ;;  %2499 = vmatpush1.bf16.msra.mxu1 %v385_v15  ;;  %v363_v15 = vld [vmem:[%s2985_s21 + $0x1d0] sm:$0xff]  ;;  %v2617_v20 = vld [vmem:[%s4663_s1 + $0x64] ss:$8 sps:$4 sm:$0xff]  }
  0x63   : > { %851 = vperm.xlu1 %2576, %v3140_v16   ;;  %846 = vperm.xlu0 %2575, %v3155_v23   ;;  %v2599_v58 = vld [vmem:[%s4663_s1 + $0x34] ss:$8 sps:$4 sm:$0xff]  }
  0x64   : > { %579 = vmatprep.subr.bf16.mxu0 %v388_v24  ;;  %2484 = vmatprep.subr.bf16.mxu1 %v388_v24  ;;  %v397_v24 = vpack.c.bf16 %v363_v15, %v361_v14  ;;  %v3337_v60 = vld [vmem:[%s4664_s2 + $0x170] sm:$0xff]  ;;  %v3382_v15 = vld [vmem:[%s4664_s2 + $0x1a0] sm:$0xff] }
  0x65   : > { %v3363_v7 = vld [vmem:[%s4664_s2 + $0x190] sm:$0xff] }
  0x66   : > { %580 = vmatpush1.bf16.msra.mxu0 %v387_v27  ;;  %2500 = vmatpush1.bf16.msra.mxu1 %v387_v27  ;;  %v3246_v27 = vld [vmem:[%s4664_s2 + $0xf8] sm:$0xff] }
  0x67   : > { %861 = vperm.xlu1 %2576, %v3162_v28   ;;  %856 = vperm.xlu0 %2575, %v3169_v31   ;;  %v2611_v14 = vld [vmem:[%s4663_s1 + $0x54] ss:$8 sps:$4 sm:$0xff]  }
  0x68   : > { %581 = vmatprep.subr.bf16.mxu0 %v390_v34  ;;  %2485 = vmatprep.subr.bf16.mxu1 %v390_v34  ;;  %v399_v34 = vpack.c.bf16 %v367_v26, %v365_v25  ;;  %v3415_v25 = vld [vmem:[%s4664_s2 + $0x1d0] sm:$0xff]  ;;  %v2622_v26 = vld [vmem:[%s4663_s1 + $0xe0] ss:$8 sps:$4 sm:$0xff]  }
  0x6a   : > { %582 = vmatpush1.bf16.msra.mxu0 %v389_v39  ;;  %2501 = vmatpush1.bf16.msra.mxu1 %v389_v39  ;;  %v2584_v39 = vld [vmem:[%s4663_s1 + $0x80] ss:$8 sps:$4 sm:$0xff]  }
  0x6b   : > { %871 = vperm.xlu1 %2576, %v3178_v40   ;;  %866 = vperm.xlu0 %2575, %v3187_v43  }
  0x6c   : > { %583 = vmatprep.subr.bf16.mxu0 %v392_v44  ;;  %2486 = vmatprep.subr.bf16.mxu1 %v392_v44  ;;  %v4667_v44 = vmov 1  }
  0x6e   : > { %584 = vmatpush1.bf16.msra.mxu0 %v391_v49  ;;  %2502 = vmatpush1.bf16.msra.mxu1 %v391_v49  ;;  %v2592_v49 = vld [vmem:[%s4663_s1 + $0x90] ss:$8 sps:$4 sm:$0xff]  }
  0x6f   : > { %881 = vperm.xlu1 %2576, %v3198_v52   ;;  %876 = vperm.xlu0 %2575, %v3203_v55  }
  0x70   : > { %585 = vmatprep.subr.bf16.mxu0 %v394_v56  ;;  %2487 = vmatprep.subr.bf16.mxu1 %v394_v56  ;;  %v3311_v56 = vld [vmem:[%s4664_s2 + $0x150] sm:$0xff] }
  0x72   : > { %586 = vmatpush1.bf16.msra.mxu0 %v393_v59  ;;  %2503 = vmatpush1.bf16.msra.mxu1 %v393_v59  ;;  %v3330_v59 = vld [vmem:[%s4664_s2 + $0x160] sm:$0xff] }
  0x73   : > { %891 = vperm.xlu1 %2576, %v3214_v3   ;;  %886 = vperm.xlu0 %2575, %v3219_v4  }
  0x74   : > { %587 = vmatprep.subr.bf16.mxu0 %v396_v5  ;;  %2488 = vmatprep.subr.bf16.mxu1 %v396_v5  ;;  %v2605_v5 = vld [vmem:[%s4663_s1 + $0x44] ss:$8 sps:$4 sm:$0xff]  }
  0x76   : > { %588 = vmatpush1.bf16.msra.mxu0 %v395_v12  ;;  %2504 = vmatpush1.bf16.msra.mxu1 %v395_v12  ;;  %v2610_v12 = vld [vmem:[%s4663_s1 + $0xc0] ss:$8 sps:$4 sm:$0xff]  }
  0x77   : > { %901 = vperm.xlu1 %2576, %v3228_v13   ;;  %896 = vperm.xlu0 %2575, %v3235_v17  }
  0x78   : > { %589 = vmatprep.subr.bf16.mxu0 %v398_v18  ;;  %2489 = vmatprep.subr.bf16.mxu1 %v398_v18  ;;  %v3389_v18 = vld [vmem:[%s4664_s2 + $0x1b0] sm:$0xff] }
  0x7a   : > { %590 = vmatpush1.bf16.msra.mxu0 %v397_v24  ;;  %2505 = vmatpush1.bf16.msra.mxu1 %v397_v24  ;;  %v3408_v24 = vld [vmem:[%s4664_s2 + $0x1c0] sm:$0xff] }
  0x7b   : > { %911 = vperm.xlu1 %2576, %v3246_v27   ;;  %906 = vperm.xlu0 %2575, %v3251_v32  }
  0x7c   : > { %591 = vmatprep.subr.bf16.mxu0 %v400_v33  ;;  %2490 = vmatprep.subr.bf16.mxu1 %v400_v33  ;;  %v2623_v33 = vld [vmem:[%s4663_s1 + $0x74] ss:$8 sps:$4 sm:$0xff]  }
  0x7e   : > { %592 = vmatpush1.bf16.msra.mxu0 %v399_v34  ;;  %2506 = vmatpush1.bf16.msra.mxu1 %v399_v34  ;;  %v3434_v34 = vld [vmem:[%s4664_s2 + $0x1e0] sm:$0xff] }
  0x7f   : > { %2577 = vset.pattern.permute.xlu1 %v4667_v44  ;;  %1641 = vperm.xlu0 %2575, %v3258_v35  }
  0x80   : > { %1127 = vperm.xlu1 %2577, %v3017_v10   ;;  %v2591_v10 = vld [vmem:[%s4663_s1 + $0x10] ss:$8 sps:$4 sm:$0xff]  }
  0x81   : > { %594 = vmatmul.mubr.bf16.vlgmr.msra.gmra.mrb[0].mxu0 %v2581_v36  ;;  %674 = vmatmul.mubr.bf16.vlgmr.msra.gmra.mrb[0].mxu1 %v2584_v39  ;;  %v3441_v36 = vld [vmem:[%s4664_s2 + $0x1f0] sm:$0xff] }
  0x82   : > { %603 = vmatprep.mubr.bf16.mxu0 %v2587_v41  ;;  %683 = vmatprep.mubr.bf16.mxu1 %v2589_v42  ;;  %v2628_v39 = vld [vmem:[%s4663_s1 + $0xf0] ss:$8 sps:$4 sm:$0xff]   ;;  %v3461_v42 = vld [vmem:[%s4664_s2 + $0x100] sm:$0xff] }
  0x83   : > { %1656 = vperm.xlu0 %2575, %v3278_v47  }
  0x84   : > { %1131 = vperm.xlu1 %2577, %v2996_v1   ;;  %v2595_v1 = vld [vmem:[%s4663_s1 + $0xa4] ss:$8 sps:$4 sm:$0xff]  }
  0x87   : > { %1666 = vperm.xlu0 %2575, %v3285_v48  }
  0x88   : > { %1139 = vperm.xlu1 %2577, %v3037_v22   ;;  %v2597_v22 = vld [vmem:[%s4663_s1 + $0x20] ss:$8 sps:$4 sm:$0xff]  }
  0x89   : > { %604 = vmatmul.mubr.bf16.gmra.mrb[4].mxu0 %v2591_v10  ;;  %684 = vmatmul.mubr.bf16.gmra.mrb[4].mxu1 %v2592_v49 }
  0x8a   : > { %613 = vmatprep.mubr.bf16.mxu0 %v2593_v50  ;;  %693 = vmatprep.mubr.bf16.mxu1 %v2595_v1 }
  0x8b   : > { %1676 = vperm.xlu0 %2575, %v3304_v51  }
  0x8c   : > { %1147 = vperm.xlu1 %2577, %v3053_v30   ;;  %v2601_v30 = vld [vmem:[%s4663_s1 + $0xb4] ss:$8 sps:$4 sm:$0xff]  }
  0x8f   : > { %1686 = vperm.xlu0 %2575, %v3311_v56  }
  0x90   : > { %1155 = vperm.xlu1 %2577, %v3069_v38   ;;  %v2603_v38 = vld [vmem:[%s4663_s1 + $0x30] ss:$8 sps:$4 sm:$0xff]  }
  0x91   : > { %614 = vmatmul.mubr.bf16.gmra.mrb[8].mxu0 %v2597_v22  ;;  %694 = vmatmul.mubr.bf16.gmra.mrb[8].mxu1 %v2598_v57 }
  0x92   : > { %623 = vmatprep.mubr.bf16.mxu0 %v2599_v58  ;;  %703 = vmatprep.mubr.bf16.mxu1 %v2601_v30 }
  0x93   : > { %1696 = vperm.xlu0 %2575, %v3330_v59  }
  0x94   : > { %1163 = vperm.xlu1 %2577, %v3085_v46   ;;  %v2607_v46 = vld [vmem:[%s4663_s1 + $0xc4] ss:$8 sps:$4 sm:$0xff]  }
  0x97   : > { %1706 = vperm.xlu0 %2575, %v3337_v60  }
  0x98   : > { %1171 = vperm.xlu1 %2577, %v3101_v54   ;;  %v2609_v54 = vld [vmem:[%s4663_s1 + $0x40] ss:$8 sps:$4 sm:$0xff]  }
  0x99   : > { %624 = vmatmul.mubr.bf16.gmra.mrb[12].mxu0 %v2603_v38  ;;  %704 = vmatmul.mubr.bf16.gmra.mrb[12].mxu1 %v2604_v63 }
  0x9a   : > { %633 = vmatprep.mubr.bf16.mxu0 %v2605_v5  ;;  %713 = vmatprep.mubr.bf16.mxu1 %v2607_v46 }
  0x9b   : > { %1716 = vperm.xlu0 %2575, %v3356_v6  }
  0x9c   : > { %1179 = vperm.xlu1 %2577, %v3117_v62   ;;  %v2613_v62 = vld [vmem:[%s4663_s1 + $0xd4] ss:$8 sps:$4 sm:$0xff]  }
  0x9f   : > { %1726 = vperm.xlu0 %2575, %v3363_v7  }
  0xa0   : > { %1187 = vperm.xlu1 %2577, %v3133_v11   ;;  %v2615_v11 = vld [vmem:[%s4663_s1 + $0x50] ss:$8 sps:$4 sm:$0xff]  }
  0xa1   : > { %634 = vmatmul.mubr.bf16.gmra.mrb[16].mxu0 %v2609_v54  ;;  %714 = vmatmul.mubr.bf16.gmra.mrb[16].mxu1 %v2610_v12 }
  0xa2   : > { %643 = vmatprep.mubr.bf16.mxu0 %v2611_v14  ;;  %723 = vmatprep.mubr.bf16.mxu1 %v2613_v62 }
  0xa3   : > { %1736 = vperm.xlu0 %2575, %v3382_v15  }
  0xa4   : > { %1195 = vperm.xlu1 %2577, %v3155_v23   ;;  %v2619_v23 = vld [vmem:[%s4663_s1 + $0xe4] ss:$8 sps:$4 sm:$0xff]  }
  0xa7   : > { %1746 = vperm.xlu0 %2575, %v3389_v18  }
  0xa8   : > { %1203 = vperm.xlu1 %2577, %v3169_v31   ;;  %v2621_v31 = vld [vmem:[%s4663_s1 + $0x60] ss:$8 sps:$4 sm:$0xff]  }
  0xa9   : > { %644 = vmatmul.mubr.bf16.gmra.mrb[20].mxu0 %v2615_v11  ;;  %724 = vmatmul.mubr.bf16.gmra.mrb[20].mxu1 %v2616_v19 }
  0xaa   : > { %653 = vmatprep.mubr.bf16.mxu0 %v2617_v20  ;;  %733 = vmatprep.mubr.bf16.mxu1 %v2619_v23 }
  0xab   : > { %1756 = vperm.xlu0 %2575, %v3408_v24  }
  0xac   : > { %1211 = vperm.xlu1 %2577, %v3187_v43   ;;  %v2625_v43 = vld [vmem:[%s4663_s1 + $0xf4] ss:$8 sps:$4 sm:$0xff]  }
  0xaf   : > { %1766 = vperm.xlu0 %2575, %v3415_v25  }
  0xb0   : > { %1219 = vperm.xlu1 %2577, %v3203_v55   ;;  %v2627_v55 = vld [vmem:[%s4663_s1 + $0x70] ss:$8 sps:$4 sm:$0xff]  }
  0xb1   : > { %654 = vmatmul.mubr.bf16.gmra.mrb[24].mxu0 %v2621_v31  ;;  %734 = vmatmul.mubr.bf16.gmra.mrb[24].mxu1 %v2622_v26 }
  0xb2   : > { %663 = vmatprep.mubr.bf16.mxu0 %v2623_v33  ;;  %743 = vmatprep.mubr.bf16.mxu1 %v2625_v43 }
  0xb3   : > { %1776 = vperm.xlu0 %2575, %v3434_v34  }
  0xb4   : > { %1227 = vperm.xlu1 %2577, %v3219_v4  }
  0xb7   : > { %1786 = vperm.xlu0 %2575, %v3441_v36  }
  0xb8   : > { %1235 = vperm.xlu1 %2577, %v3235_v17  }
  0xb9   : > { %664 = vmatmul.mubr.bf16.gmra.mrb[28].mxu0 %v2627_v55  ;;  %744 = vmatmul.mubr.bf16.gmra.mrb[28].mxu1 %v2628_v39 }
  0xbb   : > { %2579 = vset.pattern.permute.xlu0 %v4667_v44 }
  0xbc   : > { %1243 = vperm.xlu1 %2577, %v3251_v32   ;;  %1123 = vperm.xlu0 %2579, %v3001_v2   ;;  %v3473_v2 = vld [vmem:[%s4664_s2 + $0x110] sm:$0xff] }
  0xbe   : > { %v3454_v4 = vpop.permute.xlu1 %766  ;;  %v3456_v41 = vpop.permute.xlu0 %756 }
  0xc0   : > { %2578 = vset.pattern.permute.xlu1 %v2842_v0  ;;  %1135 = vperm.xlu0 %2579, %v3012_v9   ;;  %v3484_v9 = vld [vmem:[%s4664_s2 + $0x118] sm:$0xff] }
  0xc1   : > { %1636 = vperm.xlu1 %2578, %v3461_v42  }
  0xc2   : > { %v3466_v17 = vpop.permute.xlu1 %771  ;;  %v3468_v32 = vpop.permute.xlu0 %761 }
  0xc4   : > { %1143 = vperm.xlu0 %2579, %v3032_v21   ;;  %v3495_v21 = vld [vmem:[%s4664_s2 + $0x128] sm:$0xff] }
  0xc5   : > { %1646 = vperm.xlu1 %2578, %v3473_v2  }
  0xc6   : > { %v3477_v10 = vpop.permute.xlu1 %781  ;;  %v3479_v0 = vpop.permute.xlu0 %776 }
  0xc8   : > { %1151 = vperm.xlu0 %2579, %v3048_v29   ;;  %v3506_v29 = vld [vmem:[%s4664_s2 + $0x138] sm:$0xff] }
  0xc9   : > { %1651 = vperm.xlu1 %2578, %v3484_v9  }
  0xca   : > { %v3488_v49 = vpop.permute.xlu1 %791  ;;  %v3490_v50 = vpop.permute.xlu0 %786 }
  0xcc   : > { %1159 = vperm.xlu0 %2579, %v3064_v37   ;;  %v3517_v37 = vld [vmem:[%s4664_s2 + $0x148] sm:$0xff] }
  0xcd   : > { %1661 = vperm.xlu1 %2578, %v3495_v21  }
  0xce   : > { %v3499_v1 = vpop.permute.xlu1 %801  ;;  %v3501_v22 = vpop.permute.xlu0 %796 }
  0xd0   : > { %1167 = vperm.xlu0 %2579, %v3080_v45   ;;  %v3528_v45 = vld [vmem:[%s4664_s2 + $0x158] sm:$0xff] }
  0xd1   : > { %1671 = vperm.xlu1 %2578, %v3506_v29  }
  0xd2   : > { %v3510_v57 = vpop.permute.xlu1 %811  ;;  %v3512_v58 = vpop.permute.xlu0 %806 }
  0xd3   : > { %4738 = vst [vmem:[#allocation8_spill] sm:$0xff] %v3510_v57  ;;  %4739 = vst [vmem:[#allocation9_spill] sm:$0xff] %v3512_v58 }
  0xd4   : > { %1175 = vperm.xlu0 %2579, %v3096_v53   ;;  %v3539_v53 = vld [vmem:[%s4664_s2 + $0x168] sm:$0xff] }
  0xd5   : > { %1681 = vperm.xlu1 %2578, %v3517_v37  }
  0xd6   : > { %v3521_v30 = vpop.permute.xlu1 %821  ;;  %v3523_v38 = vpop.permute.xlu0 %816 }
  0xd7   : > { %4740 = vst [vmem:[#allocation10_spill] sm:$0xff] %v3521_v30  ;;  %4741 = vst [vmem:[#allocation11_spill] sm:$0xff] %v3523_v38 }
  0xd8   : > { %1183 = vperm.xlu0 %2579, %v3112_v61   ;;  %v3550_v61 = vld [vmem:[%s4664_s2 + $0x178] sm:$0xff] }
  0xd9   : > { %1691 = vperm.xlu1 %2578, %v3528_v45  }
  0xda   : > { %v3532_v63 = vpop.permute.xlu1 %831  ;;  %v3534_v5 = vpop.permute.xlu0 %826 }
  0xdb   : > { %4742 = vst [vmem:[#allocation12_spill] sm:$0xff] %v3532_v63  ;;  %4743 = vst [vmem:[#allocation13_spill] sm:$0xff] %v3534_v5  ;;  %v304_v5 = vld [vmem:[%s4664_s2 + $0x1f8] sm:$0xff] }
  0xdc   : > { %1191 = vperm.xlu0 %2579, %v3128_v8   ;;  %v3561_v8 = vld [vmem:[%s4664_s2 + $0x188] sm:$0xff] }
  0xdd   : > { %1701 = vperm.xlu1 %2578, %v3539_v53  }
  0xde   : > { %v3543_v46 = vpop.permute.xlu1 %841  ;;  %v3545_v54 = vpop.permute.xlu0 %836 }
  0xe0   : > { %1199 = vperm.xlu0 %2579, %v3140_v16   ;;  %v292_v16 = vld [vmem:[%s4664_s2 + $0x198] sm:$0xff] }
  0xe1   : > { %1711 = vperm.xlu1 %2578, %v3550_v61  }
  0xe2   : > { %v3554_v12 = vpop.permute.xlu1 %851  ;;  %v3556_v14 = vpop.permute.xlu0 %846 }
  0xe4   : > { %1207 = vperm.xlu0 %2579, %v3162_v28   ;;  %v294_v28 = vld [vmem:[%s4664_s2 + $0x1a8] sm:$0xff] }
  0xe5   : > { %1721 = vperm.xlu1 %2578, %v3561_v8  }
  0xe6   : > { %v3565_v62 = vpop.permute.xlu1 %861  ;;  %v3567_v11 = vpop.permute.xlu0 %856 }
  0xe8   : > { %1215 = vperm.xlu0 %2579, %v3178_v40   ;;  %v296_v40 = vld [vmem:[%s4664_s2 + $0x1b8] sm:$0xff] }
  0xe9   : > { %1731 = vperm.xlu1 %2578, %v292_v16  }
  0xea   : > { %v3573_v19 = vpop.permute.xlu1 %871  ;;  %v3575_v20 = vpop.permute.xlu0 %866 }
  0xec   : > { %1223 = vperm.xlu0 %2579, %v3198_v52   ;;  %v298_v52 = vld [vmem:[%s4664_s2 + $0x1c8] sm:$0xff] }
  0xed   : > { %1741 = vperm.xlu1 %2578, %v294_v28  }
  0xee   : > { %v3581_v23 = vpop.permute.xlu1 %881  ;;  %v3583_v31 = vpop.permute.xlu0 %876 }
  0xf0   : > { %1231 = vperm.xlu0 %2579, %v3214_v3   ;;  %v300_v3 = vld [vmem:[%s4664_s2 + $0x1d8] sm:$0xff] }
  0xf1   : > { %1751 = vperm.xlu1 %2578, %v296_v40  }
  0xf2   : > { %v3589_v26 = vpop.permute.xlu1 %891  ;;  %v3591_v33 = vpop.permute.xlu0 %886 }
  0xf3   : > { %4744 = vst [vmem:[#allocation14_spill] sm:$0xff] %v3589_v26  ;;  %4745 = vst [vmem:[#allocation15_spill] sm:$0xff] %v3591_v33 }
  0xf4   : > { %1239 = vperm.xlu0 %2579, %v3228_v13   ;;  %v302_v13 = vld [vmem:[%s4664_s2 + $0x1e8] sm:$0xff] }
  0xf5   : > { %1761 = vperm.xlu1 %2578, %v298_v52  }
  0xf6   : > { %v3597_v43 = vpop.permute.xlu1 %901  ;;  %v3599_v55 = vpop.permute.xlu0 %896 }
  0xf7   : > { %4746 = vst [vmem:[#allocation16_spill] sm:$0xff] %v3597_v43  ;;  %4747 = vst [vmem:[#allocation17_spill] sm:$0xff] %v3599_v55 }
  0xf8   : > { %1247 = vperm.xlu0 %2579, %v3246_v27  }
  0xf9   : > { %1771 = vperm.xlu1 %2578, %v300_v3  }
  0xfa   : > { %v3605_v39 = vpop.permute.xlu1 %911  ;;  %v3607_v44 = vpop.permute.xlu0 %906 }
  0xfb   : > { %4748 = vst [vmem:[#allocation18_spill] sm:$0xff] %v3605_v39  ;;  %4749 = vst [vmem:[#allocation19_spill] sm:$0xff] %v3607_v44  ;;  %v4752_v44 = vmov 1  }
  0xfc   : > { %1875 = vperm.xlu0 %2579, %v3461_v42  }
  0xfd   : > { %1781 = vperm.xlu1 %2578, %v302_v13  }
  0xfe   : > { %v3613_v63 = vpop.permute.xlu0 %1641 }
  0xff   : > { %4750 = vst [vmem:[#allocation20_spill] sm:$0xff] %v3613_v63  ;;  %v3618_v43 = vpop.permute.xlu1 %1127 }
 0x100   : > { %1887 = vperm.xlu0 %2579, %v3484_v9  }
 0x101   : > { %1791 = vperm.xlu1 %2578, %v304_v5  }
 0x102   : > { %v3621_v27 = vpop.permute.xlu0 %1656 }
 0x103   : > { %4751 = vst [vmem:[#allocation21_spill] sm:$0xff] %v3621_v27  ;;  %v3623_v39 = vpop.permute.xlu1 %1131 }
 0x104   : > { %1895 = vperm.xlu0 %2579, %v3495_v21  }
 0x105   : > { %2580 = vset.pattern.permute.xlu1 %v4752_v44 }
 0x106   : > { %1879 = vperm.xlu1 %2580, %v3258_v35   ;;  %v3628_v42 = vpop.permute.xlu0 %1666 }
 0x107   : > { %4753 = vst [vmem:[#allocation22_spill] sm:$0xff] %v3628_v42  ;;  %v3630_v30 = vpop.permute.xlu1 %1139 }
 0x108   : > { %1903 = vperm.xlu0 %2579, %v3506_v29  }
 0x10a   : > { %1883 = vperm.xlu1 %2580, %v3473_v2   ;;  %v3634_v9 = vpop.permute.xlu0 %1676 }
 0x10b   : > { %4754 = vst [vmem:[#allocation23_spill] sm:$0xff] %v3634_v9  ;;  %v3636_v63 = vpop.permute.xlu1 %1147 }
 0x10c   : > { %1911 = vperm.xlu0 %2579, %v3517_v37  }
 0x10e   : > { %1891 = vperm.xlu1 %2580, %v3278_v47   ;;  %v3640_v21 = vpop.permute.xlu0 %1686 }
 0x10f   : > { %4755 = vst [vmem:[#allocation24_spill] sm:$0xff] %v3640_v21  ;;  %v3642_v44 = vpop.permute.xlu1 %1155 }
 0x110   : > { %1919 = vperm.xlu0 %2579, %v3528_v45  }
 0x112   : > { %1899 = vperm.xlu1 %2580, %v3285_v48   ;;  %v3646_v35 = vpop.permute.xlu0 %1696 }
 0x113   : > { %4756 = vst [vmem:[#allocation25_spill] sm:$0xff] %v3646_v35  ;;  %v3648_v29 = vpop.permute.xlu1 %1163 }
 0x114   : > { %4757 = vst [vmem:[#allocation26_spill] sm:$0xff] %v3648_v29  ;;  %1927 = vperm.xlu0 %2579, %v3539_v53  }
 0x116   : > { %1907 = vperm.xlu1 %2580, %v3304_v51   ;;  %v3652_v2 = vpop.permute.xlu0 %1706 }
 0x117   : > { %4758 = vst [vmem:[#allocation27_spill] sm:$0xff] %v3652_v2  ;;  %v3654_v37 = vpop.permute.xlu1 %1171 }
 0x118   : > { %4759 = vst [vmem:[#allocation28_spill] sm:$0xff] %v3654_v37  ;;  %1935 = vperm.xlu0 %2579, %v3550_v61  }
 0x11a   : > { %1915 = vperm.xlu1 %2580, %v3311_v56   ;;  %v3658_v47 = vpop.permute.xlu0 %1716 }
 0x11b   : > { %4760 = vst [vmem:[#allocation29_spill] sm:$0xff] %v3658_v47  ;;  %v3661_v48 = vpop.permute.xlu1 %1179 }
 0x11c   : > { %1943 = vperm.xlu0 %2579, %v3561_v8   ;;  %4761 = vst [vmem:[#allocation30_spill] sm:$0xff] %v3661_v48 }
 0x11e   : > { %1923 = vperm.xlu1 %2580, %v3330_v59   ;;  %v3664_v45 = vpop.permute.xlu0 %1726 }
 0x11f   : > { %4762 = vst [vmem:[#allocation31_spill] sm:$0xff] %v3664_v45  ;;  %v1188_v53 = vpop.permute.xlu1 %1187 }
 0x120   : > { %1951 = vperm.xlu0 %2579, %v292_v16  }
 0x122   : > { %1931 = vperm.xlu1 %2580, %v3337_v60   ;;  %v3667_v51 = vpop.permute.xlu0 %1736 }
 0x123   : > { %4763 = vst [vmem:[#allocation32_spill] sm:$0xff] %v3667_v51  ;;  %v3672_v61 = vpop.permute.xlu1 %1195 }
 0x124   : > { %1959 = vperm.xlu0 %2579, %v294_v28  }
 0x126   : > { %1939 = vperm.xlu1 %2580, %v3356_v6   ;;  %v3670_v56 = vpop.permute.xlu0 %1746 }
 0x127   : > { %4764 = vst [vmem:[#allocation33_spill] sm:$0xff] %v3670_v56  ;;  %v3680_v60 = vpop.permute.xlu1 %1203 }
 0x128   : > { %1967 = vperm.xlu0 %2579, %v296_v40  }
 0x12a   : > { %1947 = vperm.xlu1 %2580, %v3363_v7   ;;  %v3675_v8 = vpop.permute.xlu0 %1756 }
 0x12b   : > { %4765 = vst [vmem:[#allocation34_spill] sm:$0xff] %v3675_v8  ;;  %v3685_v16 = vpop.permute.xlu1 %1211 }
 0x12c   : > { %1975 = vperm.xlu0 %2579, %v298_v52  }
 0x12e   : > { %1955 = vperm.xlu1 %2580, %v3382_v15   ;;  %v3678_v59 = vpop.permute.xlu0 %1766 }
 0x12f   : > { %4766 = vst [vmem:[#allocation35_spill] sm:$0xff] %v3678_v59  ;;  %v3691_v28 = vpop.permute.xlu1 %1219 }
 0x130   : > { %1983 = vperm.xlu0 %2579, %v300_v3  }
 0x132   : > { %1963 = vperm.xlu1 %2580, %v3389_v18   ;;  %v3683_v6 = vpop.permute.xlu0 %1776 }
 0x133   : > { %4767 = vst [vmem:[#allocation36_spill] sm:$0xff] %v3683_v6  ;;  %v3696_v18 = vpop.permute.xlu1 %1227 }
 0x134   : > { %1991 = vperm.xlu0 %2579, %v302_v13   ;;  %4769 = vst [vmem:[#allocation38_spill] sm:$0xff] %v3696_v18 }
 0x136   : > { %1971 = vperm.xlu1 %2580, %v3408_v24   ;;  %v3688_v7 = vpop.permute.xlu0 %1786 }
 0x137   : > { %4768 = vst [vmem:[#allocation37_spill] sm:$0xff] %v3688_v7  ;;  %v3703_v24 = vpop.permute.xlu1 %1235 }
 0x138   : > { %1999 = vperm.xlu0 %2579, %v304_v5   ;;  %4770 = vst [vmem:[#allocation39_spill] sm:$0xff] %v3703_v24 }
 0x13a   : > { %1979 = vperm.xlu1 %2580, %v3415_v25  }
 0x13b   : > { %v1124_v15 = vpop.permute.xlu0 %1123  ;;  %v3707_v25 = vpop.permute.xlu1 %1243 }
 0x13c   : > { %4771 = vst [vmem:[#allocation40_spill] sm:$0xff] %v3707_v25 }
 0x13e   : > { %1987 = vperm.xlu1 %2580, %v3434_v34  }
 0x13f   : > { %v3694_v40 = vpop.permute.xlu0 %1135 }
 0x140   : > { %v3713_v34 = vpop.permute.xlu1 %1636 }
 0x141   : > { %4774 = vst [vmem:[#allocation43_spill] sm:$0xff] %v3713_v34 }
 0x142   : > { %1995 = vperm.xlu1 %2580, %v3441_v36  }
 0x143   : > { %v3699_v52 = vpop.permute.xlu0 %1143 }
 0x144   : > { %v3727_v26 = vpop.permute.xlu1 %1646 }
 0x145   : > { %4776 = vst [vmem:[#allocation45_spill] sm:$0xff] %v3727_v26 }
 0x147   : > { %v3701_v3 = vpop.permute.xlu0 %1151 }
 0x14b   : > { %v3705_v5 = vpop.permute.xlu0 %1159 }
 0x14f   : > { %v3709_v13 = vpop.permute.xlu0 %1167 }
 0x150   : > { %4772 = vst [vmem:[#allocation41_spill] sm:$0xff] %v3709_v13 }
 0x153   : > { %v3711_v7 = vpop.permute.xlu0 %1175 }
 0x154   : > { %4773 = vst [vmem:[#allocation42_spill] sm:$0xff] %v3711_v7  ;;  %v595_v6 = vpop.f32.mrb[0].mxu0  ;;  %v675_v59 = vpop.f32.mrb[0].mxu1 }
 0x155   : > { %v597_v8 = vpop.f32.mrb[1].mxu0  ;;  %v914_v36 = vmul.f32 %v3456_v41, %v595_v6  ;;  %v1282_v2 = vmul.f32 %v1188_v53, %v675_v59  ;;  %v677_v35 = vpop.f32.mrb[1].mxu1  ;;  %v1250_v51 = vmul.f32 %v1124_v15, %v595_v6  ;;  %v946_v27 = vmul.f32 %v3545_v54, %v675_v59 }
 0x156   : > { %v599_v56 = vpop.f32.mrb[2].mxu0  ;;  %v1283_v45 = vmul.f32 %v1188_v53, %v677_v35  ;;  %v679_v9 = vpop.f32.mrb[2].mxu1  ;;  %v915_v25 = vmul.f32 %v3456_v41, %v597_v8  ;;  %v1251_v48 = vmul.f32 %v1124_v15, %v597_v8 }
 0x157   : > { %v916_v47 = vmul.f32 %v3468_v32, %v599_v56  ;;  %v1252_v21 = vmul.f32 %v3618_v43, %v599_v56  ;;  %v3718_v42 = vpop.permute.xlu0 %1183  ;;  %v948_v7 = vmul.f32 %v3543_v46, %v679_v9  ;;  %v601_v24 = vpop.f32.mrb[3].mxu0  ;;  %v947_v56 = vmul.f32 %v3545_v54, %v677_v35 }
 0x158   : > { %4775 = vst [vmem:[#allocation44_spill] sm:$0xff] %v3718_v42  ;;  %v681_v55 = vpop.f32.mrb[3].mxu1  ;;  %v917_v53 = vmul.f32 %v3468_v32, %v601_v24  ;;  %v1253_v6 = vmul.f32 %v3618_v43, %v601_v24 }
 0x159   : > { %v978_v37 = vadd.f32 %v916_v47, %v914_v36  ;;  %v1314_v38 = vadd.f32 %v1252_v21, %v1250_v51  ;;  %v1050_v34 = vadd.f32 %v948_v7, %v946_v27  ;;  %v949_v42 = vmul.f32 %v3543_v46, %v681_v55 }
 0x15a   : > { %v987_v59 = vadd.f32 %v917_v53, %v915_v25  ;;  %v1323_v41 = vadd.f32 %v1253_v6, %v1251_v48 }
 0x15b   : > { %v1192_v8 = vpop.permute.xlu0 %1191  ;;  %v1059_v15 = vadd.f32 %v949_v42, %v947_v56 }
 0x15c   : > { %v1284_v13 = vmul.f32 %v1192_v8, %v679_v9  ;;  %v1285_v57 = vmul.f32 %v1192_v8, %v681_v55  ;;  %v605_v18 = vpop.f32.mrb[4].mxu0  ;;  %v685_v47 = vpop.f32.mrb[4].mxu1 }
 0x15d   : > { %v918_v21 = vmul.f32 %v3454_v4, %v605_v18  ;;  %v1254_v32 = vmul.f32 %v3623_v39, %v605_v18  ;;  %v950_v43 = vmul.f32 %v3556_v14, %v685_v47  ;;  %v1286_v54 = vmul.f32 %v3672_v61, %v685_v47  ;;  %v607_v27 = vpop.f32.mrb[5].mxu0  ;;  %v687_v42 = vpop.f32.mrb[5].mxu1 }
 0x15e   : > { %v1386_v46 = vadd.f32 %v1284_v13, %v1282_v2  ;;  %v1395_v35 = vadd.f32 %v1285_v57, %v1283_v45  ;;  %v919_v51 = vmul.f32 %v3454_v4, %v607_v27  ;;  %v1255_v48 = vmul.f32 %v3623_v39, %v607_v27  ;;  %v609_v9 = vpop.f32.mrb[6].mxu0  ;;  %v689_v36 = vpop.f32.mrb[6].mxu1 }
 0x15f   : > { %v979_v55 = vadd.f32 %v978_v37, %v918_v21  ;;  %v1315_v7 = vadd.f32 %v1314_v38, %v1254_v32  ;;  %v1051_v24 = vadd.f32 %v1050_v34, %v950_v43  ;;  %v951_v25 = vmul.f32 %v3556_v14, %v687_v42  ;;  %v1200_v18 = vpop.permute.xlu0 %1199  ;;  %v611_v2 = vpop.f32.mrb[7].mxu0 }
 0x160   : > { %v1387_v53 = vadd.f32 %v1386_v46, %v1286_v54  ;;  %v988_v6 = vadd.f32 %v987_v59, %v919_v51  ;;  %v1324_v56 = vadd.f32 %v1323_v41, %v1255_v48  ;;  %v1287_v8 = vmul.f32 %v3672_v61, %v687_v42  ;;  %v691_v57 = vpop.f32.mrb[7].mxu1  ;;  %v3737_v45 = vpop.permute.xlu1 %1651 }
 0x161   : > { %4777 = vst [vmem:[#allocation46_spill] sm:$0xff] %v3737_v45  ;;  %v1060_v4 = vadd.f32 %v1059_v15, %v951_v25  ;;  %v920_v39 = vmul.f32 %v3466_v17, %v609_v9  ;;  %v1256_v37 = vmul.f32 %v3694_v40, %v609_v9  ;;  %v952_v38 = vmul.f32 %v3554_v12, %v689_v36 }
 0x162   : > { %v1396_v13 = vadd.f32 %v1395_v35, %v1287_v8  ;;  %v1288_v14 = vmul.f32 %v1200_v18, %v689_v36  ;;  %v921_v34 = vmul.f32 %v3466_v17, %v611_v2  ;;  %v1257_v59 = vmul.f32 %v3694_v40, %v611_v2 }
 0x163   : > { %v980_v41 = vadd.f32 %v979_v55, %v920_v39  ;;  %v1316_v47 = vadd.f32 %v1315_v7, %v1256_v37  ;;  %v1052_v61 = vadd.f32 %v1051_v24, %v952_v38  ;;  %v953_v21 = vmul.f32 %v3554_v12, %v691_v57 }
 0x164   : > { %v1388_v32 = vadd.f32 %v1387_v53, %v1288_v14  ;;  %v989_v43 = vadd.f32 %v988_v6, %v921_v34  ;;  %v1325_v15 = vadd.f32 %v1324_v56, %v1257_v59  ;;  %v1289_v54 = vmul.f32 %v1200_v18, %v691_v57  ;;  %v3745_v27 = vpop.f32.mrb[8].mxu0  ;;  %v3747_v46 = vpop.f32.mrb[8].mxu1 }
 0x165   : > { %v981_v51 = vrot.slane %v980_v41, 4  ;;  %v1317_v35 = vrot.slane %v1316_v47, 4  ;;  %v1053_v48 = vrot.slane %v1052_v61, 4  ;;  %v1061_v42 = vadd.f32 %v1060_v4, %v953_v21  ;;  %v3749_v17 = vpop.f32.mrb[9].mxu0  ;;  %v3751_v24 = vpop.f32.mrb[9].mxu1 }
 0x166   : > { %v1389_v40 = vrot.slane %v1388_v32, 4  ;;  %v990_v9 = vrot.slane %v989_v43, 4  ;;  %v1326_v55 = vrot.slane %v1325_v15, 4  ;;  %v1397_v7 = vadd.f32 %v1396_v13, %v1289_v54  ;;  %v3753_v12 = vpop.f32.mrb[10].mxu0  ;;  %v3755_v25 = vpop.permute.xlu1 %1661 }
 0x167   : > { %4778 = vst [vmem:[#allocation47_spill] sm:$0xff] %v3755_v25  ;;  %v982_v36 = vadd.f32 %v981_v51, %v980_v41  ;;  %v1318_v18 = vadd.f32 %v1317_v35, %v1316_v47  ;;  %v1054_v53 = vadd.f32 %v1053_v48, %v1052_v61  ;;  %v1062_v6 = vrot.slane %v1061_v42, 4  ;;  %v3757_v56 = vpop.f32.mrb[10].mxu1  ;;  %v3759_v39 = vpop.f32.mrb[11].mxu0 }
 0x168   : > { %v1390_v8 = vadd.f32 %v1389_v40, %v1388_v32  ;;  %v991_v2 = vadd.f32 %v990_v9, %v989_v43  ;;  %v1327_v57 = vadd.f32 %v1326_v55, %v1325_v15  ;;  %v1398_v4 = vrot.slane %v1397_v7, 4  ;;  %v3761_v37 = vpop.f32.mrb[11].mxu1 }
 0x169   : > { %v983_v38 = vrot.slane %v982_v36, 2  ;;  %v1319_v13 = vrot.slane %v1318_v18, 2  ;;  %v1055_v14 = vrot.slane %v1054_v53, 2  ;;  %v1063_v34 = vadd.f32 %v1062_v6, %v1061_v42 }
 0x16a   : > { %v1391_v59 = vrot.slane %v1390_v8, 2  ;;  %v992_v21 = vrot.slane %v991_v2, 2  ;;  %v1328_v41 = vrot.slane %v1327_v57, 2  ;;  %v1399_v47 = vadd.f32 %v1398_v4, %v1397_v7  ;;  %v3767_v55 = vpop.permute.xlu1 %1671 }
 0x16b   : > { %v984_v61 = vadd.f32 %v983_v38, %v982_v36  ;;  %v1320_v54 = vadd.f32 %v1319_v13, %v1318_v18  ;;  %v1056_v51 = vadd.f32 %v1055_v14, %v1054_v53  ;;  %v1064_v35 = vrot.slane %v1063_v34, 2  ;;  %4779 = vst [vmem:[#allocation48_spill] sm:$0xff] %v3767_v55 }
 0x16c   : > { %v1392_v32 = vadd.f32 %v1391_v59, %v1390_v8  ;;  %v993_v43 = vadd.f32 %v992_v21, %v991_v2  ;;  %v1329_v15 = vadd.f32 %v1328_v41, %v1327_v57  ;;  %v1400_v48 = vrot.slane %v1399_v47, 2  ;;  %v3763_v40 = vpop.f32.mrb[12].mxu0  ;;  %v3765_v9 = vpop.f32.mrb[12].mxu1 }
 0x16d   : > { %v985_v26 = vrot.slane %v984_v61, 1  ;;  %v1321_v42 = vrot.slane %v1320_v54, 1  ;;  %v1057_v6 = vrot.slane %v1056_v51, 1  ;;  %v1065_v25 = vadd.f32 %v1064_v35, %v1063_v34  ;;  %v3769_v45 = vpop.f32.mrb[13].mxu0  ;;  %v3771_v8 = vpop.f32.mrb[13].mxu1 }
 0x16e   : > { %v1393_v7 = vrot.slane %v1392_v32, 1  ;;  %v994_v36 = vrot.slane %v993_v43, 1  ;;  %v1330_v18 = vrot.slane %v1329_v15, 1  ;;  %v1401_v53 = vadd.f32 %v1400_v48, %v1399_v47  ;;  %v3773_v2 = vpop.f32.mrb[14].mxu0  ;;  %v3775_v14 = vpop.f32.mrb[14].mxu1 }
 0x16f   : > { %v986_v57 = vadd.f32 %v985_v26, %v984_v61  ;;  %v1322_v4 = vadd.f32 %v1321_v42, %v1320_v54  ;;  %v1058_v38 = vadd.f32 %v1057_v6, %v1056_v51  ;;  %v1066_v13 = vrot.slane %v1065_v25, 1  ;;  %v3777_v35 = vpop.f32.mrb[15].mxu0  ;;  %v3779_v55 = vpop.f32.mrb[15].mxu1 }
 0x170   : > { %v1394_v59 = vadd.f32 %v1393_v7, %v1392_v32  ;;  %v995_v21 = vadd.f32 %v994_v36, %v993_v43  ;;  %v1331_v41 = vadd.f32 %v1330_v18, %v1329_v15  ;;  %v1402_v34 = vrot.slane %v1401_v53, 1  ;;  %v3787_v43 = vpop.permute.xlu1 %1681 }
 0x171   : > { %v1458_v33 = vmax.f32 %v986_v57, %v1322_v4  ;;  %v1067_v47 = vadd.f32 %v1066_v13, %v1065_v25  ;;  %v922_v48 = vmul.f32 %v3479_v0, %v3745_v27  ;;  %v1258_v26 = vmul.f32 %v3630_v30, %v3745_v27  ;;  %4780 = vst [vmem:[#allocation49_spill] sm:$0xff] %v3787_v43 }
 0x172   : > { %v1466_v61 = vmax.f32 %v1058_v38, %v1394_v59  ;;  %v1459_v54 = vmax.f32 %v995_v21, %v1331_v41  ;;  %v1403_v51 = vadd.f32 %v1402_v34, %v1401_v53  ;;  %v954_v32 = vmul.f32 %v3567_v11, %v3747_v46 }
 0x173   : > { %v1474_v15 = vsub.f32 %v986_v57, %v1458_v33  ;;  %v1522_v42 = vsub.f32 %v1322_v4, %v1458_v33  ;;  %v1290_v6 = vmul.f32 %v3680_v60, %v3747_v46  ;;  %v923_v25 = vmul.f32 %v3479_v0, %v3749_v17 }
 0x174   : > { %v1482_v7 = vsub.f32 %v1058_v38, %v1466_v61  ;;  %v1530_v36 = vsub.f32 %v1394_v59, %v1466_v61  ;;  %v1475_v18 = vsub.f32 %v995_v21, %v1459_v54  ;;  %v1523_v27 = vsub.f32 %v1331_v41, %v1459_v54  ;;  %v3793_v13 = vpop.f32.mrb[16].mxu0  ;;  %v3795_v53 = vpop.f32.mrb[16].mxu1 }
 0x175   : > { %v1490_v34 = vmul.f32 1.442695, %v1474_v15  ;;  %v1538_v29 = vmul.f32 1.442695, %v1522_v42  ;;  %v1467_v58 = vmax.f32 %v1067_v47, %v1403_v51  ;;  %v1259_v33 = vmul.f32 %v3630_v30, %v3749_v17  ;;  %v3799_v57 = vpop.f32.mrb[17].mxu0  ;;  %v3803_v41 = vpop.f32.mrb[17].mxu1 }
 0x176   : > { %v1506_v46 = vmul.f32 1.442695, %v1482_v7  ;;  %v1554_v4 = vmul.f32 1.442695, %v1530_v36  ;;  %v1492_v43 = vmul.f32 1.442695, %v1475_v18  ;;  %v955_v0 = vmul.f32 %v3567_v11, %v3751_v24  ;;  %v1208_v54 = vpop.permute.xlu0 %1207  ;;  %v3821_v7 = vpop.permute.xlu1 %1691 }
 0x177   : > { %2629 = vpow2.f32 %v1490_v34  ;;  %v1540_v38 = vmul.f32 1.442695, %v1523_v27  ;;  %v1483_v59 = vsub.f32 %v1067_v47, %v1467_v58  ;;  %v1531_v21 = vsub.f32 %v1403_v51, %v1467_v58  ;;  %v3805_v61 = vpop.f32.mrb[18].mxu0  ;;  %v3813_v11 = vpop.f32.mrb[18].mxu1  ;;  %4781 = vst [vmem:[#allocation50_spill] sm:$0xff] %v3821_v7 }
 0x178   : > { %2631 = vpow2.f32 %v1538_v29  ;;  %v1291_v30 = vmul.f32 %v3680_v60, %v3751_v24  ;;  %v924_v17 = vmul.f32 %v3477_v10, %v3753_v12  ;;  %v1260_v15 = vmul.f32 %v3699_v52, %v3753_v12  ;;  %v3817_v42 = vpop.f32.mrb[19].mxu0  ;;  %v3819_v29 = vpop.f32.mrb[19].mxu1 }
 0x179   : > { %2633 = vpow2.f32 %v1506_v46  ;;  %v1508_v47 = vmul.f32 1.442695, %v1483_v59  ;;  %v1556_v58 = vmul.f32 1.442695, %v1531_v21  ;;  %v956_v51 = vmul.f32 %v3565_v62, %v3757_v56 }
 0x17a   : > { %2635 = vpow2.f32 %v1554_v4  ;;  %v996_v60 = vadd.f32 %v924_v17, %v922_v48  ;;  %v1332_v24 = vadd.f32 %v1260_v15, %v1258_v26  ;;  %v1292_v36 = vmul.f32 %v1208_v54, %v3757_v56 }
 0x17b   : > { %2637 = vpow2.f32 %v1492_v43  ;;  %v1068_v12 = vadd.f32 %v956_v51, %v954_v32  ;;  %v925_v18 = vmul.f32 %v3477_v10, %v3759_v39  ;;  %v1261_v27 = vmul.f32 %v3699_v52, %v3759_v39 }
 0x17c   : > { %2639 = vpow2.f32 %v1540_v38  ;;  %v1404_v34 = vadd.f32 %v1292_v36, %v1290_v6  ;;  %v957_v46 = vmul.f32 %v3565_v62, %v3761_v37  ;;  %v1293_v59 = vmul.f32 %v1208_v54, %v3761_v37  ;;  %v3831_v4 = vpop.f32.mrb[20].mxu0  ;;  %v3835_v32 = vpop.f32.mrb[20].mxu1 }
 0x17d   : > { %2641 = vpow2.f32 %v1508_v47  ;;  %v1005_v48 = vadd.f32 %v925_v18, %v923_v25  ;;  %v1341_v56 = vadd.f32 %v1261_v27, %v1259_v33  ;;  %v926_v26 = vmul.f32 %v3490_v50, %v3763_v40  ;;  %v3837_v10 = vpop.f32.mrb[21].mxu0  ;;  %v3841_v43 = vpop.f32.mrb[21].mxu1 }
 0x17e   : > { %2643 = vpow2.f32 %v1556_v58  ;;  %v1077_v52 = vadd.f32 %v957_v46, %v955_v0  ;;  %v1413_v39 = vadd.f32 %v1293_v59, %v1291_v30  ;;  %v1262_v62 = vmul.f32 %v3636_v63, %v3763_v40  ;;  %v3849_v38 = vpop.f32.mrb[22].mxu0  ;;  %v3851_v21 = vpop.f32.mrb[22].mxu1 }
 0x17f   : > { %v997_v37 = vadd.f32 %v996_v60, %v926_v26  ;;  %v958_v6 = vmul.f32 %v3575_v20, %v3765_v9  ;;  %v1294_v25 = vmul.f32 %v3685_v16, %v3765_v9  ;;  %v927_v33 = vmul.f32 %v3490_v50, %v3769_v45  ;;  %v3853_v0 = vpop.permute.xlu1 %1701  ;;  %v3861_v9 = vpop.f32.mrb[23].mxu0 }
 0x180   : > { %4782 = vst [vmem:[#allocation51_spill] sm:$0xff] %v3853_v0  ;;  %v1333_v54 = vadd.f32 %v1332_v24, %v1262_v62  ;;  %v1263_v40 = vmul.f32 %v3636_v63, %v3769_v45  ;;  %v959_v30 = vmul.f32 %v3575_v20, %v3771_v8  ;;  %v1295_v17 = vmul.f32 %v3685_v16, %v3771_v8  ;;  %v3867_v60 = vpop.f32.mrb[23].mxu1  ;;  %v1216_v63 = vpop.permute.xlu0 %1215 }
 0x181   : > { %v3863_v15 = vpop.eup %2629  ;;  %v1069_v50 = vadd.f32 %v1068_v12, %v958_v6  ;;  %v1405_v47 = vadd.f32 %v1404_v34, %v1294_v25  ;;  %v1006_v58 = vadd.f32 %v1005_v48, %v927_v33  ;;  %v928_v51 = vmul.f32 %v3488_v49, %v3773_v2 }
 0x182   : > { %v3869_v24 = vpop.eup %2631  ;;  %v1342_v45 = vadd.f32 %v1341_v56, %v1263_v40  ;;  %v1078_v20 = vadd.f32 %v1077_v52, %v959_v30  ;;  %v1414_v36 = vadd.f32 %v1413_v39, %v1295_v17  ;;  %v1264_v16 = vmul.f32 %v3701_v3, %v3773_v2 }
 0x183   : > { %v3873_v8 = vpop.eup %2633  ;;  %v998_v18 = vadd.f32 %v997_v37, %v928_v51  ;;  %v960_v12 = vmul.f32 %v3573_v19, %v3775_v14  ;;  %v1296_v27 = vmul.f32 %v1216_v63, %v3775_v14  ;;  %v929_v34 = vmul.f32 %v3488_v49, %v3777_v35 }
 0x184   : > { %v3880_v46 = vpop.eup %2635  ;;  %v1334_v59 = vadd.f32 %v1333_v54, %v1264_v16  ;;  %v1265_v48 = vmul.f32 %v3701_v3, %v3777_v35  ;;  %v961_v2 = vmul.f32 %v3573_v19, %v3779_v55  ;;  %v1297_v56 = vmul.f32 %v1216_v63, %v3779_v55  ;;  %v3887_v26 = vpop.f32.mrb[24].mxu0 }
 0x185   : > { %4783 = vst [vmem:[#allocation52_spill] sm:$0xff] %v3880_v46  ;;  %v3889_v52 = vpop.eup %2637  ;;  %v1578_v14 = vadd.f32 %v3880_v46, %v3873_v8  ;;  %v999_v39 = vrot.slane %v998_v18, 4  ;;  %v1070_v49 = vadd.f32 %v1069_v50, %v960_v12  ;;  %v1406_v62 = vadd.f32 %v1405_v47, %v1296_v27  ;;  %v3893_v37 = vpop.f32.mrb[24].mxu1 }
 0x186   : > { %v3895_v6 = vpop.f32.mrb[25].mxu0  ;;  %v3897_v3 = vpop.eup %2639  ;;  %v1335_v19 = vrot.slane %v1334_v59, 4  ;;  %v1007_v55 = vadd.f32 %v1006_v58, %v929_v34  ;;  %v1343_v25 = vadd.f32 %v1342_v45, %v1265_v48  ;;  %v1079_v33 = vadd.f32 %v1078_v20, %v961_v2 }
 0x187   : > { %4784 = vst [vmem:[#allocation53_spill] sm:$0xff] %v3895_v6  ;;  %v3899_v35 = vpop.permute.xlu1 %1711  ;;  %v3901_v54 = vpop.f32.mrb[25].mxu1  ;;  %2645 = vrcp.f32 %v1578_v14  ;;  %v1000_v30 = vadd.f32 %v999_v39, %v998_v18  ;;  %v1071_v17 = vrot.slane %v1070_v49, 4  ;;  %v1407_v50 = vrot.slane %v1406_v62, 4 }
 0x188   : > { %4785 = vst [vmem:[#allocation54_spill] sm:$0xff] %v3899_v35  ;;  %4786 = vst [vmem:[#allocation55_spill] sm:$0xff] %v3901_v54  ;;  %v3903_v40 = vpop.eup %2641  ;;  %v3905_v47 = vpop.f32.mrb[26].mxu0  ;;  %v1336_v16 = vadd.f32 %v1335_v19, %v1334_v59  ;;  %v1008_v12 = vrot.slane %v1007_v55, 4  ;;  %v1344_v27 = vrot.slane %v1343_v25, 4  ;;  %v1080_v58 = vrot.slane %v1079_v33, 4 }
 0x189   : > { %4787 = vst [vmem:[#allocation56_spill] sm:$0xff] %v3905_v47  ;;  %v3907_v51 = vpop.f32.mrb[26].mxu1  ;;  %v3909_v63 = vpop.eup %2643  ;;  %v1001_v34 = vrot.slane %v1000_v30, 2  ;;  %v1072_v48 = vadd.f32 %v1071_v17, %v1070_v49  ;;  %v1408_v18 = vadd.f32 %v1407_v50, %v1406_v62  ;;  %v1415_v17 = vadd.f32 %v1414_v36, %v1297_v56 }
 0x18a   : > { %4788 = vst [vmem:[#allocation57_spill] sm:$0xff] %v3907_v51  ;;  %4789 = vst [vmem:[#allocation58_spill] sm:$0xff] %v3909_v63  ;;  %v3911_v45 = vpop.f32.mrb[27].mxu0  ;;  %v1579_v20 = vadd.f32 %v3909_v63, %v3903_v40  ;;  %v3915_v2 = vpop.f32.mrb[27].mxu1  ;;  %v1337_v14 = vrot.slane %v1336_v16, 2  ;;  %v1009_v39 = vadd.f32 %v1008_v12, %v1007_v55  ;;  %v1345_v35 = vadd.f32 %v1344_v27, %v1343_v25 }
 0x18b   : > { %4790 = vst [vmem:[#allocation59_spill] sm:$0xff] %v3911_v45  ;;  %v1081_v0 = vadd.f32 %v1080_v58, %v1079_v33  ;;  %v1002_v46 = vadd.f32 %v1001_v34, %v1000_v30  ;;  %v1073_v59 = vrot.slane %v1072_v48, 2  ;;  %v1409_v19 = vrot.slane %v1408_v18, 2  ;;  %v1722_v7 = vpop.permute.xlu1 %1721 }
 0x18c   : > { %2647 = vrcp.f32 %v1579_v20  ;;  %v1338_v51 = vadd.f32 %v1337_v14, %v1336_v16  ;;  %v1010_v47 = vrot.slane %v1009_v39, 2  ;;  %v1346_v45 = vrot.slane %v1345_v35, 2  ;;  %v3917_v6 = vpop.f32.mrb[28].mxu0  ;;  %v3919_v50 = vpop.f32.mrb[28].mxu1 }
 0x18d   : > { %v1082_v54 = vrot.slane %v1081_v0, 2  ;;  %4791 = vst [vmem:[#allocation60_spill] sm:$0xff] %v3917_v6  ;;  %v1003_v63 = vrot.slane %v1002_v46, 1  ;;  %v1074_v49 = vadd.f32 %v1073_v59, %v1072_v48  ;;  %v1410_v62 = vadd.f32 %v1409_v19, %v1408_v18  ;;  %v3921_v55 = vpop.f32.mrb[29].mxu0  ;;  %v3923_v27 = vpop.f32.mrb[29].mxu1 }
 0x18e   : > { %v1339_v25 = vrot.slane %v1338_v51, 1  ;;  %v1011_v33 = vadd.f32 %v1010_v47, %v1009_v39  ;;  %v1347_v30 = vadd.f32 %v1346_v45, %v1345_v35  ;;  %v1416_v34 = vrot.slane %v1415_v17, 4  ;;  %v3925_v14 = vpop.f32.mrb[30].mxu0  ;;  %v3927_v6 = vpop.f32.mrb[30].mxu1 }
 0x18f   : > { %v1083_v12 = vadd.f32 %v1082_v54, %v1081_v0  ;;  %v1004_v16 = vadd.f32 %v1003_v63, %v1002_v46  ;;  %v1075_v58 = vrot.slane %v1074_v49, 1  ;;  %v1411_v20 = vrot.slane %v1410_v62, 1  ;;  %4792 = vst [vmem:[#allocation61_spill] sm:$0xff] %v3925_v14  ;;  %4793 = vst [vmem:[#allocation62_spill] sm:$0xff] %v3927_v6  ;;  %v3929_v59 = vpop.f32.mrb[31].mxu0  ;;  %v3935_v47 = vpop.f32.mrb[31].mxu1 }
 0x190   : > { %v1340_v48 = vadd.f32 %v1339_v25, %v1338_v51  ;;  %v1012_v36 = vrot.slane %v1011_v33, 1  ;;  %v1348_v56 = vrot.slane %v1347_v30, 1  ;;  %4794 = vst [vmem:[#allocation63_spill] sm:$0xff] %v3929_v59  ;;  %v1417_v54 = vadd.f32 %v1416_v34, %v1415_v17  ;;  %v1732_v25 = vpop.permute.xlu1 %1731 }
 0x191   : > { %v1084_v18 = vrot.slane %v1083_v12, 1  ;;  %v3931_v19 = vpop.eup %2645  ;;  %v1076_v35 = vadd.f32 %v1075_v58, %v1074_v49  ;;  %v1412_v0 = vadd.f32 %v1411_v20, %v1410_v62  ;;  %v930_v46 = vmul.f32 %v3501_v22, %v3793_v13 }
 0x192   : > { %v3939_v63 = vmul.f32 %v3931_v19, %v3873_v8  ;;  %v1460_v51 = vmax.f32 %v1004_v16, %v1340_v48  ;;  %v1013_v45 = vadd.f32 %v1012_v36, %v1011_v33  ;;  %v1349_v39 = vadd.f32 %v1348_v56, %v1347_v30 }
 0x193   : > { %v1468_v6 = vmax.f32 %v1076_v35, %v1412_v0  ;;  %v1085_v59 = vadd.f32 %v1084_v18, %v1083_v12  ;;  %v1418_v14 = vrot.slane %v1417_v54, 2  ;;  %v1266_v49 = vmul.f32 %v3642_v44, %v3793_v13 }
 0x194   : > { %4795 = vst [vmem:[#allocation64_spill] sm:$0xff] %v3939_v63  ;;  %v3944_v62 = vmul.f32 %v1722_v7, %v3939_v63  ;;  %v3947_v17 = vmul.f32 %v1732_v25, %v3939_v63  ;;  %v1476_v58 = vsub.f32 %v1004_v16, %v1460_v51  ;;  %v1524_v20 = vsub.f32 %v1340_v48, %v1460_v51 }
 0x195   : > { %v1484_v34 = vsub.f32 %v1076_v35, %v1468_v6  ;;  %v1532_v33 = vsub.f32 %v1412_v0, %v1468_v6  ;;  %v1461_v30 = vmax.f32 %v1013_v45, %v1349_v39  ;;  %v1419_v36 = vadd.f32 %v1418_v14, %v1417_v54 }
 0x196   : > { %4796 = vst [vmem:[#allocation65_spill] sm:$0xff] %v3944_v62  ;;  %4797 = vst [vmem:[#allocation66_spill] sm:$0xff] %v3947_v17  ;;  %v3949_v8 = vpop.eup %2647  ;;  %v1494_v56 = vmul.f32 1.442695, %v1476_v58  ;;  %v1542_v13 = vmul.f32 1.442695, %v1524_v20  ;;  %v962_v18 = vmul.f32 %v3583_v31, %v3795_v53  ;;  %v1224_v62 = vpop.permute.xlu0 %1223  ;;  %v1298_v0 = vmul.f32 %v3691_v28, %v3795_v53 }
 0x197   : > { %v3953_v12 = vmul.f32 %v3949_v8, %v3903_v40  ;;  %v1510_v63 = vmul.f32 1.442695, %v1484_v34  ;;  %v1558_v17 = vmul.f32 1.442695, %v1532_v33  ;;  %v1477_v16 = vsub.f32 %v1013_v45, %v1461_v30 }
 0x198   : > { %v1525_v48 = vsub.f32 %v1349_v39, %v1461_v30  ;;  %2649 = vpow2.f32 %v1494_v56  ;;  %v1420_v14 = vrot.slane %v1419_v36, 1  ;;  %v931_v45 = vmul.f32 %v3501_v22, %v3799_v57  ;;  %v3969_v39 = vpop.permute.xlu1 %1741 }
 0x199   : > { %v3958_v51 = vmul.f32 %v1722_v7, %v3953_v12  ;;  %v3961_v6 = vmul.f32 %v1732_v25, %v3953_v12  ;;  %2651 = vpow2.f32 %v1542_v13  ;;  %v1496_v40 = vmul.f32 1.442695, %v1477_v16 }
 0x19a   : > { %v1544_v35 = vmul.f32 1.442695, %v1525_v48  ;;  %2653 = vpow2.f32 %v1510_v63  ;;  %v1421_v54 = vadd.f32 %v1420_v14, %v1419_v36  ;;  %v1267_v7 = vmul.f32 %v3642_v44, %v3799_v57  ;;  %v3981_v57 = vpop.permute.xlu0 %1231  ;;  %v4798_v48 = vld [vmem:[#allocation9_spill] sm:$0xff]  ;;  %v4799_v14 = vld [vmem:[#allocation26_spill] sm:$0xff] }
 0x19b   : > { %2655 = vpow2.f32 %v1558_v17  ;;  %v963_v25 = vmul.f32 %v3583_v31, %v3803_v41  ;;  %v1299_v58 = vmul.f32 %v3691_v28, %v3803_v41  ;;  %v932_v53 = vmul.f32 %v3499_v1, %v3805_v61 }
 0x19c   : > { %2657 = vpow2.f32 %v1496_v40  ;;  %v1469_v63 = vmax.f32 %v1085_v59, %v1421_v54  ;;  %v1268_v22 = vmul.f32 %v3705_v5, %v3805_v61  ;;  %v964_v44 = vmul.f32 %v3581_v23, %v3813_v11 }
 0x19d   : > { %2659 = vpow2.f32 %v1544_v35  ;;  %v1014_v17 = vadd.f32 %v932_v53, %v930_v46  ;;  %v1300_v31 = vmul.f32 %v1224_v62, %v3813_v11  ;;  %v933_v28 = vmul.f32 %v3499_v1, %v3817_v42  ;;  %v3993_v1 = vpop.permute.xlu1 %1751 }
 0x19e   : > { %v1485_v41 = vsub.f32 %v1085_v59, %v1469_v63  ;;  %v1533_v20 = vsub.f32 %v1421_v54, %v1469_v63  ;;  %v1350_v34 = vadd.f32 %v1268_v22, %v1266_v49  ;;  %v1086_v33 = vadd.f32 %v964_v44, %v962_v18 }
 0x19f   : > { %v1422_v30 = vadd.f32 %v1300_v31, %v1298_v0  ;;  %v1023_v36 = vadd.f32 %v933_v28, %v931_v45  ;;  %v1269_v61 = vmul.f32 %v3705_v5, %v3817_v42  ;;  %v965_v56 = vmul.f32 %v3581_v23, %v3819_v29  ;;  %v4007_v0 = vpop.permute.xlu0 %1239  ;;  %v4801_v45 = vld [vmem:[#allocation38_spill] sm:$0xff] }
 0x1a0   : > { %v1512_v13 = vmul.f32 1.442695, %v1485_v41  ;;  %v1560_v16 = vmul.f32 1.442695, %v1533_v20  ;;  %v1301_v46 = vmul.f32 %v1224_v62, %v3819_v29  ;;  %v1570_v11 = vadd.f32 %v3869_v24, %v3863_v15  ;;  %v4800_v62 = vld [vmem:[#allocation15_spill] sm:$0xff] }
 0x1a1   : > { %v1359_v59 = vadd.f32 %v1269_v61, %v1267_v7  ;;  %v1095_v49 = vadd.f32 %v965_v56, %v963_v25  ;;  %v1571_v18 = vadd.f32 %v3897_v3, %v3889_v52  ;;  %v934_v5 = vmul.f32 %v4798_v48, %v3831_v4  ;;  %v4031_v61 = vpop.permute.xlu1 %1761 }
 0x1a2   : > { %v3999_v42 = vpop.eup %2649  ;;  %2661 = vpow2.f32 %v1512_v13  ;;  %v1431_v23 = vadd.f32 %v1301_v46, %v1299_v58  ;;  %v1270_v29 = vmul.f32 %v4799_v14, %v3831_v4  ;;  %v966_v40 = vmul.f32 %v4800_v62, %v3835_v32  ;;  %4803 = vst [vmem:[#allocation9_spill] sm:$0xff] %v4031_v61  ;;  %v4805_v13 = vld [vmem:[#allocation14_spill] sm:$0xff] }
 0x1a3   : > { %v4005_v35 = vpop.eup %2651  ;;  %2663 = vpow2.f32 %v1560_v16  ;;  %v1015_v54 = vadd.f32 %v1014_v17, %v934_v5  ;;  %v1302_v7 = vmul.f32 %v4801_v45, %v3835_v32  ;;  %v935_v25 = vmul.f32 %v4798_v48, %v3837_v10 }
 0x1a4   : > { %v4013_v53 = vpop.eup %2653  ;;  %2665 = vrcp.f32 %v1570_v11  ;;  %v1351_v58 = vadd.f32 %v1350_v34, %v1270_v29  ;;  %v1087_v4 = vadd.f32 %v1086_v33, %v966_v40  ;;  %v1271_v63 = vmul.f32 %v4799_v14, %v3837_v10  ;;  %v4802_v34 = vld [vmem:[#allocation8_spill] sm:$0xff] }
 0x1a5   : > { %v4017_v22 = vpop.eup %2655  ;;  %2667 = vrcp.f32 %v1571_v18  ;;  %v1423_v44 = vadd.f32 %v1422_v30, %v1302_v7  ;;  %v1024_v31 = vadd.f32 %v1023_v36, %v935_v25  ;;  %v967_v17 = vmul.f32 %v4800_v62, %v3841_v43  ;;  %v4804_v36 = vld [vmem:[#allocation41_spill] sm:$0xff]  ;;  %v4041_v18 = vpop.permute.xlu0 %1247 }
 0x1a6   : > { %v4021_v32 = vpop.eup %2657  ;;  %v1580_v28 = vadd.f32 %v4017_v22, %v4013_v53  ;;  %v1360_v41 = vadd.f32 %v1359_v59, %v1271_v63  ;;  %v1303_v20 = vmul.f32 %v4801_v45, %v3841_v43  ;;  %v936_v10 = vmul.f32 %v4802_v34, %v3849_v38 }
 0x1a7   : > { %v4029_v33 = vpop.eup %2659  ;;  %v1096_v30 = vadd.f32 %v1095_v49, %v967_v17  ;;  %v1272_v56 = vmul.f32 %v4804_v36, %v3849_v38  ;;  %v968_v16 = vmul.f32 %v4805_v13, %v3851_v21  ;;  %v1304_v46 = vmul.f32 %v3981_v57, %v3851_v21 }
 0x1a8   : > { %2669 = vrcp.f32 %v1580_v28  ;;  %v1432_v11 = vadd.f32 %v1431_v23, %v1303_v20  ;;  %v1016_v43 = vadd.f32 %v1015_v54, %v936_v10  ;;  %v937_v59 = vmul.f32 %v4802_v34, %v3861_v9 }
 0x1a9   : > { %v1352_v48 = vadd.f32 %v1351_v58, %v1272_v56  ;;  %v1088_v5 = vadd.f32 %v1087_v4, %v968_v16  ;;  %v1424_v49 = vadd.f32 %v1423_v44, %v1304_v46  ;;  %v1273_v38 = vmul.f32 %v4804_v36, %v3861_v9  ;;  %v4055_v44 = vpop.permute.xlu1 %1771  ;;  %v1876_v56 = vpop.permute.xlu0 %1875 }
 0x1aa   : > { %v1017_v14 = vrot.slane %v1016_v43, 4  ;;  %v1025_v29 = vadd.f32 %v1024_v31, %v937_v59  ;;  %v969_v62 = vmul.f32 %v4805_v13, %v3867_v60  ;;  %v1305_v21 = vmul.f32 %v3981_v57, %v3867_v60  ;;  %4806 = vst [vmem:[#allocation26_spill] sm:$0xff] %v4055_v44 }
 0x1ab   : > { %v1353_v23 = vrot.slane %v1352_v48, 4  ;;  %v1089_v40 = vrot.slane %v1088_v5, 4  ;;  %v1425_v54 = vrot.slane %v1424_v49, 4  ;;  %v1361_v45 = vadd.f32 %v1360_v41, %v1273_v38 }
 0x1ac   : > { %v4049_v7 = vpop.eup %2661  ;;  %v1018_v25 = vadd.f32 %v1017_v14, %v1016_v43  ;;  %v1026_v58 = vrot.slane %v1025_v29, 4  ;;  %v1097_v4 = vadd.f32 %v1096_v30, %v969_v62  ;;  %v4051_v63 = vadd.f32 %v1432_v11, %v1305_v21 }
 0x1ad   : > { %v4053_v9 = vpop.eup %2663  ;;  %v1354_v31 = vadd.f32 %v1353_v23, %v1352_v48  ;;  %v1090_v17 = vadd.f32 %v1089_v40, %v1088_v5  ;;  %v1426_v28 = vadd.f32 %v1425_v54, %v1424_v49  ;;  %v1362_v20 = vrot.slane %v1361_v45, 4  ;;  %v4807_v48 = vld [vmem:[#allocation43_spill] sm:$0xff]  ;;  %v4083_v23 = vpop.permute.xlu1 %1781 }
 0x1ae   : > { %v2666_v60 = vpop.eup %2665  ;;  %v1581_v57 = vadd.f32 %v4053_v9, %v4049_v7  ;;  %v1019_v41 = vrot.slane %v1018_v25, 2  ;;  %v1027_v34 = vadd.f32 %v1026_v58, %v1025_v29  ;;  %v1098_v10 = vrot.slane %v1097_v4, 4  ;;  %4808 = vst [vmem:[#allocation15_spill] sm:$0xff] %v4083_v23 }
 0x1af   : > { %v2668_v36 = vpop.eup %2667  ;;  %v4060_v30 = vmul.f32 %v2666_v60, %v3863_v15  ;;  %v4063_v13 = vmul.f32 %v2666_v60, %v3869_v24  ;;  %v1355_v16 = vrot.slane %v1354_v31, 2  ;;  %v1091_v46 = vrot.slane %v1090_v17, 2 }
 0x1b0   : > { %2671 = vrcp.f32 %v1581_v57  ;;  %v4066_v11 = vmul.f32 %v2668_v36, %v3889_v52  ;;  %v4069_v43 = vmul.f32 %v2668_v36, %v3897_v3  ;;  %v1020_v59 = vadd.f32 %v1019_v41, %v1018_v25 }
 0x1b1   : > { %v1794_v5 = vmul.f32 %v4807_v48, %v4060_v30  ;;  %v2002_v49 = vmul.f32 %v1876_v56, %v4063_v13  ;;  %v1356_v15 = vadd.f32 %v1355_v16, %v1354_v31  ;;  %v1092_v38 = vadd.f32 %v1091_v46, %v1090_v17  ;;  %v4809_v17 = vld [vmem:[#allocation46_spill] sm:$0xff] }
 0x1b2   : > { %v4074_v14 = vpop.eup %2669  ;;  %v1795_v24 = vmul.f32 %v4807_v48, %v4066_v11  ;;  %v2003_v29 = vmul.f32 %v1876_v56, %v4069_v43  ;;  %v1021_v52 = vrot.slane %v1020_v59, 1  ;;  %v1427_v62 = vrot.slane %v1426_v28, 2  ;;  %v1888_v56 = vpop.permute.xlu0 %1887 }
 0x1b3   : > { %v4081_v3 = vmul.f32 %v4074_v14, %v4013_v53  ;;  %v2066_v21 = vadd.f32 %v2002_v49, %v1794_v5  ;;  %v1357_v40 = vrot.slane %v1356_v15, 1  ;;  %v1093_v54 = vrot.slane %v1092_v38, 1 }
 0x1b4   : > { %v2067_v25 = vadd.f32 %v2003_v29, %v1795_v24  ;;  %v1022_v58 = vadd.f32 %v1021_v52, %v1020_v59  ;;  %v1428_v31 = vadd.f32 %v1427_v62, %v1426_v28  ;;  %v1800_v60 = vmul.f32 %v4809_v17, %v4060_v30 }
 0x1b5   : > { %v4089_v57 = vmul.f32 %v3993_v1, %v4081_v3  ;;  %v1358_v41 = vadd.f32 %v1357_v40, %v1356_v15  ;;  %v1094_v36 = vadd.f32 %v1093_v54, %v1092_v38  ;;  %v1801_v53 = vmul.f32 %v4809_v17, %v4066_v11  ;;  %2130 = vxpose.xlu1.b32.start [1/16] %v2066_v21, 128  ;;  %v4100_v17 = vpop.permute.xlu1 %1791 }
 0x1b6   : > { %v1429_v16 = vrot.slane %v1428_v31, 1  ;;  %v2008_v46 = vmul.f32 %v1888_v56, %v4063_v13  ;;  %v2009_v59 = vmul.f32 %v1888_v56, %v4069_v43  ;;  %v1028_v28 = vrot.slane %v1027_v34, 2  ;;  %2162 = vxpose.xlu0.b32.start [1/16] %v2067_v25, 128  ;;  %4811 = vst [vmem:[#allocation8_spill] sm:$0xff] %v4100_v17 }
 0x1b7   : > { %4810 = vst [vmem:[#allocation38_spill] sm:$0xff] %v4089_v57  ;;  %v1462_v48 = vmax.f32 %v1022_v58, %v1358_v41  ;;  %v1363_v5 = vadd.f32 %v1362_v20, %v1361_v45  ;;  %v1099_v49 = vadd.f32 %v1098_v10, %v1097_v4  ;;  %v1434_v24 = vrot.slane %v4051_v63, 4 }
 0x1b8   : > { %v1430_v29 = vadd.f32 %v1429_v16, %v1428_v31  ;;  %v4096_v15 = vadd.f32 %v2008_v46, %v1800_v60  ;;  %v4098_v38 = vadd.f32 %v2009_v59, %v1801_v53  ;;  %v1029_v52 = vadd.f32 %v1028_v28, %v1027_v34 }
 0x1b9   : > { %v1478_v62 = vsub.f32 %v1022_v58, %v1462_v48  ;;  %v1526_v21 = vsub.f32 %v1358_v41, %v1462_v48  ;;  %v1364_v40 = vrot.slane %v1363_v5, 2  ;;  %v1100_v54 = vrot.slane %v1099_v49, 2 }
 0x1ba   : > { %v4102_v56 = vpop.eup %2671  ;;  %v1470_v25 = vmax.f32 %v1094_v36, %v1430_v29  ;;  %v1030_v23 = vrot.slane %v1029_v52, 1  ;;  %v1435_v45 = vadd.f32 %v1434_v24, %v4051_v63  ;;  %v1572_v4 = vadd.f32 %v4005_v35, %v3999_v42 }
 0x1bb   : > { %v4109_v20 = vmul.f32 %v4102_v56, %v4049_v7  ;;  %v1498_v34 = vmul.f32 1.442695, %v1478_v62  ;;  %v1546_v10 = vmul.f32 1.442695, %v1526_v21  ;;  %v1365_v58 = vadd.f32 %v1364_v40, %v1363_v5  ;;  %v4815_v40 = vld [vmem:[#allocation17_spill] sm:$0xff] }
 0x1bc   : > { %v1486_v31 = vsub.f32 %v1094_v36, %v1470_v25  ;;  %v1534_v60 = vsub.f32 %v1430_v29, %v1470_v25  ;;  %v1031_v41 = vadd.f32 %v1030_v23, %v1029_v52  ;;  %v1101_v53 = vadd.f32 %v1100_v54, %v1099_v49  ;;  %v1880_v36 = vpop.permute.xlu1 %1879  ;;  %v4813_v49 = vld [vmem:[#allocation11_spill] sm:$0xff]  ;;  %v4814_v29 = vld [vmem:[#allocation28_spill] sm:$0xff] }
 0x1bd   : > { %v4113_v16 = vmul.f32 %v3993_v1, %v4109_v20  ;;  %2673 = vpow2.f32 %v1498_v34  ;;  %v1366_v63 = vrot.slane %v1365_v58, 1  ;;  %v1436_v46 = vrot.slane %v1435_v45, 2  ;;  %v4816_v25 = vld [vmem:[#allocation39_spill] sm:$0xff] }
 0x1be   : > { %2675 = vpow2.f32 %v1546_v10  ;;  %v1514_v59 = vmul.f32 1.442695, %v1486_v31  ;;  %v1562_v28 = vmul.f32 1.442695, %v1534_v60  ;;  %v1102_v48 = vrot.slane %v1101_v53, 1 }
 0x1bf   : > { %4812 = vst [vmem:[#allocation41_spill] sm:$0xff] %v4113_v16  ;;  %v1367_v7 = vadd.f32 %v1366_v63, %v1365_v58  ;;  %v1437_v24 = vadd.f32 %v1436_v46, %v1435_v45  ;;  %v1573_v5 = vadd.f32 %v4029_v33, %v4021_v32  ;;  %2677 = vrcp.f32 %v1572_v4  ;;  %v4817_v4 = vld [vmem:[#allocation20_spill] sm:$0xff]  ;;  %v4818_v46 = vld [vmem:[#allocation53_spill] sm:$0xff] }
 0x1c0   : > { %2679 = vpow2.f32 %v1514_v59  ;;  %v1103_v23 = vadd.f32 %v1102_v48, %v1101_v53  ;;  %v938_v1 = vmul.f32 %v4813_v49, %v3887_v26  ;;  %v1274_v52 = vmul.f32 %v4814_v29, %v3887_v26  ;;  %v1896_v53 = vpop.permute.xlu0 %1895 }
 0x1c1   : > { %2681 = vpow2.f32 %v1562_v28  ;;  %v1463_v62 = vmax.f32 %v1031_v41, %v1367_v7  ;;  %v1438_v21 = vrot.slane %v1437_v24, 1  ;;  %v970_v54 = vmul.f32 %v4815_v40, %v3893_v37  ;;  %v4819_v28 = vld [vmem:[#allocation55_spill] sm:$0xff] }
 0x1c2   : > { %2683 = vrcp.f32 %v1573_v5  ;;  %v1306_v45 = vmul.f32 %v4816_v25, %v3893_v37  ;;  %v1796_v34 = vmul.f32 %v4817_v4, %v4060_v30  ;;  %v1797_v10 = vmul.f32 %v4817_v4, %v4066_v11 }
 0x1c3   : > { %v1479_v58 = vsub.f32 %v1031_v41, %v1463_v62  ;;  %v1527_v31 = vsub.f32 %v1367_v7, %v1463_v62  ;;  %v1439_v60 = vadd.f32 %v1438_v21, %v1437_v24  ;;  %v2004_v26 = vmul.f32 %v1880_v36, %v4063_v13  ;;  %v1884_v7 = vpop.permute.xlu1 %1883  ;;  %v4820_v21 = vld [vmem:[#allocation56_spill] sm:$0xff] }
 0x1c4   : > { %v2005_v63 = vmul.f32 %v1880_v36, %v4069_v43  ;;  %v939_v59 = vmul.f32 %v4813_v49, %v4818_v46  ;;  %v1275_v37 = vmul.f32 %v4814_v29, %v4818_v46  ;;  %v971_v48 = vmul.f32 %v4815_v40, %v4819_v28  ;;  %v4821_v36 = vld [vmem:[#allocation10_spill] sm:$0xff] }
 0x1c5   : > { %v1500_v5 = vmul.f32 1.442695, %v1479_v58  ;;  %v1548_v17 = vmul.f32 1.442695, %v1527_v31  ;;  %v1471_v4 = vmax.f32 %v1103_v23, %v1439_v60  ;;  %v2068_v41 = vadd.f32 %v2004_v26, %v1796_v34  ;;  %v4822_v49 = vld [vmem:[#allocation42_spill] sm:$0xff]  ;;  %v4823_v58 = vld [vmem:[#allocation57_spill] sm:$0xff] }
 0x1c6   : > { %v2069_v24 = vadd.f32 %v2005_v63, %v1797_v10  ;;  %v1307_v62 = vmul.f32 %v4816_v25, %v4819_v28  ;;  %v940_v44 = vmul.f32 %v4821_v36, %v4820_v21  ;;  %v1276_v61 = vmul.f32 %v4822_v49, %v4820_v21  ;;  %v4824_v31 = vld [vmem:[#allocation16_spill] sm:$0xff] }
 0x1c7   : > { %v4143_v16 = vpop.eup %2673  ;;  %2685 = vpow2.f32 %v1500_v5  ;;  %v1487_v29 = vsub.f32 %v1103_v23, %v1471_v4  ;;  %v1535_v40 = vsub.f32 %v1439_v60, %v1471_v4  ;;  %v972_v46 = vmul.f32 %v4824_v31, %v4823_v58  ;;  %2131 = vxpose.xlu1.b32.cont [2/16] %v2068_v41, 128  ;;  %v4825_v5 = vld [vmem:[#allocation59_spill] sm:$0xff] }
 0x1c8   : > { %v4147_v34 = vpop.eup %2675  ;;  %2687 = vpow2.f32 %v1548_v17  ;;  %v1032_v10 = vadd.f32 %v940_v44, %v938_v1  ;;  %v1368_v25 = vadd.f32 %v1276_v61, %v1274_v52  ;;  %v1308_v26 = vmul.f32 %v4007_v0, %v4823_v58  ;;  %2163 = vxpose.xlu0.b32.cont [2/16] %v2069_v24, 128  ;;  %v1904_v44 = vpop.permute.xlu0 %1903 }
 0x1c9   : > { %v2678_v63 = vpop.eup %2677  ;;  %v1516_v28 = vmul.f32 1.442695, %v1487_v29  ;;  %v1564_v21 = vmul.f32 1.442695, %v1535_v40  ;;  %v1104_v57 = vadd.f32 %v972_v46, %v970_v54  ;;  %v941_v23 = vmul.f32 %v4821_v36, %v4825_v5  ;;  %v1892_v24 = vpop.permute.xlu1 %1891 }
 0x1ca   : > { %v4153_v60 = vpop.eup %2679  ;;  %v4156_v4 = vmul.f32 %v2678_v63, %v3999_v42  ;;  %v4159_v17 = vmul.f32 %v2678_v63, %v4005_v35  ;;  %v1440_v61 = vadd.f32 %v1308_v26, %v1306_v45  ;;  %v1277_v1 = vmul.f32 %v4822_v49, %v4825_v5  ;;  %v4827_v35 = vld [vmem:[#allocation47_spill] sm:$0xff]  ;;  %v4828_v49 = vld [vmem:[#allocation48_spill] sm:$0xff]  ;;  %v4829_v63 = vld [vmem:[#allocation45_spill] sm:$0xff] }
 0x1cb   : > { %v4163_v52 = vpop.eup %2681  ;;  %2689 = vpow2.f32 %v1516_v28  ;;  %v4165_v54 = vadd.f32 %v941_v23, %v939_v59  ;;  %v973_v41 = vmul.f32 %v4824_v31, %v3915_v2  ;;  %v1309_v42 = vmul.f32 %v4007_v0, %v3915_v2 }
 0x1cc   : > { %4826 = vst [vmem:[#allocation14_spill] sm:$0xff] %v4163_v52  ;;  %v2684_v36 = vpop.eup %2683  ;;  %2691 = vpow2.f32 %v1564_v21  ;;  %v1804_v45 = vmul.f32 %v4827_v35, %v4156_v4  ;;  %v2012_v29 = vmul.f32 %v1896_v53, %v4159_v17  ;;  %v1808_v40 = vmul.f32 %v4828_v49, %v4156_v4  ;;  %v4835_v52 = vld [vmem:[#allocation21_spill] sm:$0xff] }
 0x1cd   : > { %v4177_v59 = vmul.f32 %v2684_v36, %v4021_v32  ;;  %v4180_v58 = vmul.f32 %v2684_v36, %v4029_v33  ;;  %v2016_v31 = vmul.f32 %v1904_v44, %v4159_v17  ;;  %v1377_v2 = vadd.f32 %v1277_v1, %v1275_v37  ;;  %v4831_v36 = vld [vmem:[#allocation13_spill] sm:$0xff] }
 0x1ce   : > { %v4183_v0 = vadd.f32 %v2012_v29, %v1804_v45  ;;  %v1113_v46 = vadd.f32 %v973_v41, %v971_v48  ;;  %v1449_v26 = vadd.f32 %v1309_v42, %v1307_v62  ;;  %v1798_v28 = vmul.f32 %v4829_v63, %v4060_v30  ;;  %v4199_v30 = vpop.permute.xlu0 %1911  ;;  %v4830_v42 = vld [vmem:[#allocation60_spill] sm:$0xff]  ;;  %v4211_v45 = vpop.permute.xlu1 %1899 }
 0x1cf   : > { %v1805_v21 = vmul.f32 %v4827_v35, %v4177_v59  ;;  %v2013_v5 = vmul.f32 %v1896_v53, %v4180_v58  ;;  %v1809_v32 = vmul.f32 %v4828_v49, %v4177_v59  ;;  %v2017_v33 = vmul.f32 %v1904_v44, %v4180_v58  ;;  %v4833_v49 = vld [vmem:[#allocation19_spill] sm:$0xff] }
 0x1d0   : > { %v4193_v23 = vadd.f32 %v2016_v31, %v1808_v40  ;;  %v1799_v37 = vmul.f32 %v4829_v63, %v4066_v11  ;;  %v2006_v48 = vmul.f32 %v1884_v7, %v4063_v13  ;;  %v2007_v62 = vmul.f32 %v1884_v7, %v4069_v43  ;;  %v4832_v7 = vld [vmem:[#allocation30_spill] sm:$0xff] }
 0x1d1   : > { %v4201_v1 = vpop.eup %2685  ;;  %v4203_v41 = vadd.f32 %v2013_v5, %v1805_v21  ;;  %v4205_v53 = vadd.f32 %v2017_v33, %v1809_v32  ;;  %v1574_v44 = vadd.f32 %v4147_v34, %v4143_v16  ;;  %v942_v35 = vmul.f32 %v4831_v36, %v4830_v42  ;;  %v4834_v21 = vld [vmem:[#allocation40_spill] sm:$0xff] }
 0x1d2   : > { %v4213_v11 = vpop.eup %2687  ;;  %v2070_v13 = vadd.f32 %v2006_v48, %v1798_v28  ;;  %v2071_v43 = vadd.f32 %v2007_v62, %v1799_v37  ;;  %v1278_v29 = vmul.f32 %v4832_v7, %v4830_v42  ;;  %v974_v40 = vmul.f32 %v4833_v49, %v3919_v50 }
 0x1d3   : > { %v1575_v31 = vadd.f32 %v4213_v11, %v4201_v1  ;;  %2693 = vrcp.f32 %v1574_v44  ;;  %v1033_v63 = vadd.f32 %v1032_v10, %v942_v35  ;;  %v1310_v5 = vmul.f32 %v4834_v21, %v3919_v50 }
 0x1d4   : > { %v1369_v32 = vadd.f32 %v1368_v25, %v1278_v29  ;;  %v1105_v33 = vadd.f32 %v1104_v57, %v974_v40  ;;  %v1802_v28 = vmul.f32 %v4835_v52, %v4156_v4  ;;  %v1803_v37 = vmul.f32 %v4835_v52, %v4177_v59  ;;  %2132 = vxpose.xlu1.b32.cont [3/16] %v2070_v13, 128  ;;  %v4839_v40 = vld [vmem:[#allocation44_spill] sm:$0xff] }
 0x1d5   : > { %v4227_v48 = vpop.eup %2689  ;;  %2695 = vrcp.f32 %v1575_v31  ;;  %v1441_v62 = vadd.f32 %v1440_v61, %v1310_v5  ;;  %v2010_v42 = vmul.f32 %v1892_v24, %v4159_v17  ;;  %v2011_v10 = vmul.f32 %v1892_v24, %v4180_v58  ;;  %2164 = vxpose.xlu0.b32.cont [3/16] %v2071_v43, 128  ;;  %v4241_v61 = vpop.permute.xlu0 %1919  ;;  %v4837_v24 = vld [vmem:[#allocation61_spill] sm:$0xff]  ;;  %v4838_v43 = vld [vmem:[#allocation12_spill] sm:$0xff] }
 0x1d6   : > { %v4231_v44 = vpop.eup %2691  ;;  %v943_v50 = vmul.f32 %v4831_v36, %v3921_v55  ;;  %v1279_v57 = vmul.f32 %v4832_v7, %v3921_v55  ;;  %v975_v25 = vmul.f32 %v4833_v49, %v3923_v27  ;;  %v1311_v52 = vmul.f32 %v4834_v21, %v3923_v27  ;;  %v4247_v36 = vpop.permute.xlu1 %1907 }
 0x1d7   : > { %4836 = vst [vmem:[#allocation43_spill] sm:$0xff] %v4231_v44  ;;  %v2074_v35 = vadd.f32 %v2010_v42, %v1802_v28  ;;  %v2075_v13 = vadd.f32 %v2011_v10, %v1803_v37  ;;  %v944_v29 = vmul.f32 %v4838_v43, %v4837_v24  ;;  %v1280_v31 = vmul.f32 %v4839_v40, %v4837_v24  ;;  %v4840_v44 = vld [vmem:[#allocation62_spill] sm:$0xff]  ;;  %v4842_v10 = vld [vmem:[#allocation63_spill] sm:$0xff] }
 0x1d8   : > { %v1042_v55 = vadd.f32 %v4165_v54, %v943_v50  ;;  %v1378_v7 = vadd.f32 %v1377_v2, %v1279_v57  ;;  %v1114_v5 = vadd.f32 %v1113_v46, %v975_v25  ;;  %v1450_v49 = vadd.f32 %v1449_v26, %v1311_v52  ;;  %2133 = vxpose.xlu1.b32.cont [4/16] %v4096_v15, 128  ;;  %v4841_v28 = vld [vmem:[#allocation18_spill] sm:$0xff] }
 0x1d9   : > { %v1034_v27 = vadd.f32 %v1033_v63, %v944_v29  ;;  %v1370_v21 = vadd.f32 %v1369_v32, %v1280_v31  ;;  %v976_v37 = vmul.f32 %v4841_v28, %v4840_v44  ;;  %v1312_v42 = vmul.f32 %v4041_v18, %v4840_v44  ;;  %2165 = vxpose.xlu0.b32.cont [4/16] %v4098_v38, 128  ;;  %v4268_v25 = vpop.permute.xlu0 %1927 }
 0x1da   : > { %v945_v24 = vmul.f32 %v4838_v43, %v4842_v10  ;;  %v1281_v54 = vmul.f32 %v4839_v40, %v4842_v10  ;;  %v977_v2 = vmul.f32 %v4841_v28, %v3935_v47  ;;  %v1313_v15 = vmul.f32 %v4041_v18, %v3935_v47  ;;  %v4270_v28 = vpop.permute.xlu1 %1915 }
 0x1db   : > { %v1035_v46 = vrot.slane %v1034_v27, 4  ;;  %v1371_v26 = vrot.slane %v1370_v21, 4  ;;  %v1106_v63 = vadd.f32 %v1105_v33, %v976_v37  ;;  %v1442_v32 = vadd.f32 %v1441_v62, %v1312_v42 }
 0x1dc   : > { %v1043_v50 = vadd.f32 %v1042_v55, %v945_v24  ;;  %v1379_v44 = vadd.f32 %v1378_v7, %v1281_v54  ;;  %v4264_v57 = vadd.f32 %v1114_v5, %v977_v2  ;;  %v4266_v38 = vadd.f32 %v1450_v49, %v1313_v15  ;;  %2134 = vxpose.xlu1.b32.cont [5/16] %v2074_v35, 128 }
 0x1dd   : > { %v2694_v52 = vpop.eup %2693  ;;  %v1036_v43 = vadd.f32 %v1035_v46, %v1034_v27  ;;  %v1372_v29 = vadd.f32 %v1371_v26, %v1370_v21  ;;  %v1107_v40 = vrot.slane %v1106_v63, 4  ;;  %v1443_v31 = vrot.slane %v1442_v32, 4  ;;  %2166 = vxpose.xlu0.b32.cont [5/16] %v2075_v13, 128  ;;  %v4843_v21 = vld [vmem:[#allocation49_spill] sm:$0xff]  ;;  %v4298_v46 = vpop.permute.xlu0 %1935 }
 0x1de   : > { %v4273_v47 = vmul.f32 %v2694_v52, %v4143_v16  ;;  %v4276_v18 = vmul.f32 %v2694_v52, %v4147_v34  ;;  %v1044_v33 = vrot.slane %v1043_v50, 4  ;;  %v1380_v62 = vrot.slane %v1379_v44, 4  ;;  %v4300_v52 = vpop.permute.xlu1 %1923 }
 0x1df   : > { %v2696_v55 = vpop.eup %2695  ;;  %v1037_v7 = vrot.slane %v1036_v43, 2  ;;  %v1373_v5 = vrot.slane %v1372_v29, 2  ;;  %v1108_v35 = vadd.f32 %v1107_v40, %v1106_v63  ;;  %v1444_v49 = vadd.f32 %v1443_v31, %v1442_v32 }
 0x1e0   : > { %v4279_v27 = vmul.f32 %v2696_v55, %v4201_v1  ;;  %v1812_v37 = vmul.f32 %v4843_v21, %v4273_v47  ;;  %v4284_v13 = vmul.f32 %v2696_v55, %v4213_v11  ;;  %v2020_v16 = vmul.f32 %v4199_v30, %v4276_v18  ;;  %2135 = vxpose.xlu1.b32.cont [6/16] %v4183_v0, 128  ;;  %v4844_v11 = vld [vmem:[#allocation50_spill] sm:$0xff] }
 0x1e1   : > { %v1038_v34 = vadd.f32 %v1037_v7, %v1036_v43  ;;  %v1374_v42 = vadd.f32 %v1373_v5, %v1372_v29  ;;  %v1109_v10 = vrot.slane %v1108_v35, 2  ;;  %v1445_v24 = vrot.slane %v1444_v49, 2  ;;  %2167 = vxpose.xlu0.b32.cont [6/16] %v4203_v41, 128 }
 0x1e2   : > { %v1813_v1 = vmul.f32 %v4843_v21, %v4279_v27  ;;  %v2021_v54 = vmul.f32 %v4199_v30, %v4284_v13  ;;  %v4294_v2 = vadd.f32 %v2020_v16, %v1812_v37  ;;  %v1816_v15 = vmul.f32 %v4844_v11, %v4273_v47 }
 0x1e3   : > { %v1039_v0 = vrot.slane %v1038_v34, 1  ;;  %v1375_v26 = vrot.slane %v1374_v42, 1  ;;  %v1110_v63 = vadd.f32 %v1109_v10, %v1108_v35  ;;  %v1446_v32 = vadd.f32 %v1445_v24, %v1444_v49 }
 0x1e4   : > { %v4302_v41 = vadd.f32 %v2021_v54, %v1813_v1  ;;  %v1817_v43 = vmul.f32 %v4844_v11, %v4279_v27  ;;  %v2024_v30 = vmul.f32 %v4241_v61, %v4276_v18  ;;  %v2025_v29 = vmul.f32 %v4241_v61, %v4284_v13  ;;  %v4845_v61 = vld [vmem:[#allocation22_spill] sm:$0xff] }
 0x1e5   : > { %v1040_v40 = vadd.f32 %v1039_v0, %v1038_v34  ;;  %v1376_v31 = vadd.f32 %v1375_v26, %v1374_v42  ;;  %v1111_v55 = vrot.slane %v1110_v63, 1  ;;  %v1447_v7 = vrot.slane %v1446_v32, 1  ;;  %v4318_v42 = vpop.permute.xlu0 %1943 }
 0x1e6   : > { %v4310_v5 = vadd.f32 %v2024_v30, %v1816_v15  ;;  %v4312_v35 = vadd.f32 %v2025_v29, %v1817_v43  ;;  %v1045_v49 = vadd.f32 %v1044_v33, %v1043_v50  ;;  %v1381_v21 = vadd.f32 %v1380_v62, %v1379_v44  ;;  %v4321_v44 = vpop.permute.xlu1 %1931 }
 0x1e7   : > { %v1464_v37 = vmax.f32 %v1040_v40, %v1376_v31  ;;  %v1112_v16 = vadd.f32 %v1111_v55, %v1110_v63  ;;  %v1448_v10 = vadd.f32 %v1447_v7, %v1446_v32  ;;  %v1116_v24 = vrot.slane %v4264_v57, 4 }
 0x1e8   : > { %v1046_v1 = vrot.slane %v1045_v49, 2  ;;  %v1382_v54 = vrot.slane %v1381_v21, 2  ;;  %v1452_v11 = vrot.slane %v4266_v38, 4  ;;  %v1806_v34 = vmul.f32 %v4845_v61, %v4156_v4 }
 0x1e9   : > { %v1480_v15 = vsub.f32 %v1040_v40, %v1464_v37  ;;  %v1528_v0 = vsub.f32 %v1376_v31, %v1464_v37  ;;  %v1472_v26 = vmax.f32 %v1112_v16, %v1448_v10  ;;  %v1117_v50 = vadd.f32 %v1116_v24, %v4264_v57 }
 0x1ea   : > { %v1047_v33 = vadd.f32 %v1046_v1, %v1045_v49  ;;  %v1383_v62 = vadd.f32 %v1382_v54, %v1381_v21  ;;  %v1453_v63 = vadd.f32 %v1452_v11, %v4266_v38  ;;  %v1807_v32 = vmul.f32 %v4845_v61, %v4177_v59  ;;  %v1952_v1 = vpop.permute.xlu0 %1951  ;;  %v4330_v54 = vpop.permute.xlu1 %1939 }
 0x1eb   : > { %v1502_v43 = vmul.f32 1.442695, %v1480_v15  ;;  %v1550_v30 = vmul.f32 1.442695, %v1528_v0  ;;  %v1488_v29 = vsub.f32 %v1112_v16, %v1472_v26  ;;  %v1536_v4 = vsub.f32 %v1448_v10, %v1472_v26  ;;  %v4846_v15 = vld [vmem:[#allocation23_spill] sm:$0xff] }
 0x1ec   : > { %v1048_v55 = vrot.slane %v1047_v33, 1  ;;  %v1384_v7 = vrot.slane %v1383_v62, 1  ;;  %v1118_v40 = vrot.slane %v1117_v50, 2  ;;  %v1454_v31 = vrot.slane %v1453_v63, 2 }
 0x1ed   : > { %2697 = vpow2.f32 %v1502_v43  ;;  %v1518_v37 = vmul.f32 1.442695, %v1488_v29  ;;  %v1566_v57 = vmul.f32 1.442695, %v1536_v4  ;;  %v2014_v49 = vmul.f32 %v4211_v45, %v4159_v17 }
 0x1ee   : > { %2699 = vpow2.f32 %v1550_v30  ;;  %v1049_v21 = vadd.f32 %v1048_v55, %v1047_v33  ;;  %v1385_v38 = vadd.f32 %v1384_v7, %v1383_v62  ;;  %v1119_v24 = vadd.f32 %v1118_v40, %v1117_v50  ;;  %v4847_v30 = vld [vmem:[#allocation24_spill] sm:$0xff] }
 0x1ef   : > { %2701 = vpow2.f32 %v1518_v37  ;;  %v1455_v59 = vadd.f32 %v1454_v31, %v1453_v63  ;;  %v2015_v16 = vmul.f32 %v4211_v45, %v4180_v58  ;;  %v2078_v10 = vadd.f32 %v2014_v49, %v1806_v34  ;;  %v1960_v31 = vpop.permute.xlu0 %1959 }
 0x1f0   : > { %2703 = vpow2.f32 %v1566_v57  ;;  %v1465_v11 = vmax.f32 %v1049_v21, %v1385_v38  ;;  %v1120_v61 = vrot.slane %v1119_v24, 1  ;;  %v1810_v0 = vmul.f32 %v4846_v15, %v4273_v47  ;;  %v4848_v57 = vld [vmem:[#allocation52_spill] sm:$0xff] }
 0x1f1   : > { %v1456_v17 = vrot.slane %v1455_v59, 1  ;;  %v2079_v26 = vadd.f32 %v2015_v16, %v1807_v32  ;;  %v1811_v50 = vmul.f32 %v4846_v15, %v4279_v27  ;;  %v2018_v33 = vmul.f32 %v4247_v36, %v4276_v18  ;;  %2136 = vxpose.xlu1.b32.cont [7/16] %v2078_v10, 128 }
 0x1f2   : > { %v1481_v62 = vsub.f32 %v1049_v21, %v1465_v11  ;;  %v1529_v58 = vsub.f32 %v1385_v38, %v1465_v11  ;;  %v1121_v45 = vadd.f32 %v1120_v61, %v1119_v24  ;;  %v2019_v34 = vmul.f32 %v4247_v36, %v4284_v13  ;;  %v4849_v21 = vld [vmem:[#allocation58_spill] sm:$0xff]  ;;  %v1948_v38 = vpop.permute.xlu1 %1947 }
 0x1f3   : > { %v1457_v63 = vadd.f32 %v1456_v17, %v1455_v59  ;;  %v2082_v43 = vadd.f32 %v2018_v33, %v1810_v0  ;;  %v1814_v29 = vmul.f32 %v4847_v30, %v4273_v47  ;;  %v1815_v32 = vmul.f32 %v4847_v30, %v4279_v27  ;;  %2168 = vxpose.xlu0.b32.cont [7/16] %v2079_v26, 128  ;;  %v4850_v26 = vld [vmem:[#allocation65_spill] sm:$0xff] }
 0x1f4   : > { %v1504_v4 = vmul.f32 1.442695, %v1481_v62  ;;  %v1552_v55 = vmul.f32 1.442695, %v1529_v58  ;;  %v2083_v7 = vadd.f32 %v2019_v34, %v1811_v50  ;;  %v2022_v40 = vmul.f32 %v4270_v28, %v4276_v18  ;;  %v1968_v58 = vpop.permute.xlu0 %1967  ;;  %v4853_v34 = vld [vmem:[#allocation29_spill] sm:$0xff] }
 0x1f5   : > { %v1473_v37 = vmax.f32 %v1121_v45, %v1457_v63  ;;  %v2023_v36 = vmul.f32 %v4270_v28, %v4284_v13  ;;  %v1866_v49 = vmul.f32 %v3931_v19, %v4848_v57  ;;  %v1867_v47 = vmul.f32 %v3949_v8, %v4849_v21  ;;  %2137 = vxpose.xlu1.b32.cont [8/16] %v4193_v23, 128  ;;  %v4856_v21 = vld [vmem:[#allocation41_spill] sm:$0xff] }
 0x1f6   : > { %2705 = vpow2.f32 %v1504_v4  ;;  %v2086_v27 = vadd.f32 %v2022_v40, %v1814_v29  ;;  %v1836_v24 = vmul.f32 %v3969_v39, %v4081_v3  ;;  %v1837_v18 = vmul.f32 %v3969_v39, %v4109_v20 }
 0x1f7   : > { %v4357_v59 = vpop.eup %2697  ;;  %2707 = vpow2.f32 %v1552_v55  ;;  %v1489_v28 = vsub.f32 %v1121_v45, %v1473_v37  ;;  %v1537_v13 = vsub.f32 %v1457_v63, %v1473_v37  ;;  %v4359_v19 = vadd.f32 %v2023_v36, %v1815_v32  ;;  %2169 = vxpose.xlu0.b32.cont [8/16] %v4205_v53, 128  ;;  %v4852_v45 = vld [vmem:[#allocation64_spill] sm:$0xff]  ;;  %v4855_v36 = vld [vmem:[#allocation38_spill] sm:$0xff] }
 0x1f8   : > { %v4362_v8 = vpop.eup %2699  ;;  %v2036_v23 = vmul.f32 %v4318_v42, %v1866_v49  ;;  %v2037_v16 = vmul.f32 %v4318_v42, %v1867_v47  ;;  %v2040_v10 = vmul.f32 %v1952_v1, %v1866_v49  ;;  %v2041_v11 = vmul.f32 %v1952_v1, %v1867_v47  ;;  %v4851_v1 = vld [vmem:[#allocation66_spill] sm:$0xff] }
 0x1f9   : > { %v4366_v61 = vpop.eup %2701  ;;  %v1520_v39 = vmul.f32 1.442695, %v1489_v28  ;;  %v1568_v15 = vmul.f32 1.442695, %v1537_v13  ;;  %v1576_v0 = vadd.f32 %v4362_v8, %v4357_v59  ;;  %v1868_v17 = vmul.f32 %v4074_v14, %v4017_v22  ;;  %2138 = vxpose.xlu1.b32.cont [9/16] %v2082_v43, 128  ;;  %v1956_v43 = vpop.permute.xlu1 %1955  ;;  %v4857_v13 = vld [vmem:[#allocation14_spill] sm:$0xff] }
 0x1fa   : > { %v4372_v53 = vpop.eup %2703  ;;  %v4375_v50 = vadd.f32 %v2036_v23, %v4850_v26  ;;  %v4378_v42 = vadd.f32 %v2037_v16, %v3958_v51  ;;  %v4381_v33 = vadd.f32 %v2040_v10, %v4851_v1  ;;  %v4384_v62 = vadd.f32 %v2041_v11, %v3961_v6  ;;  %v4860_v1 = vld [vmem:[#allocation33_spill] sm:$0xff] }
 0x1fb   : > { %2709 = vpow2.f32 %v1520_v39  ;;  %v1869_v22 = vmul.f32 %v4102_v56, %v4053_v9  ;;  %v2044_v14 = vmul.f32 %v1960_v31, %v1868_v17  ;;  %v1826_v63 = vmul.f32 %v4853_v34, %v4852_v45  ;;  %2170 = vxpose.xlu0.b32.cont [9/16] %v2083_v7, 128  ;;  %v4854_v7 = vld [vmem:[#allocation31_spill] sm:$0xff]  ;;  %v4859_v39 = vld [vmem:[#allocation32_spill] sm:$0xff] }
 0x1fc   : > { %2711 = vpow2.f32 %v1568_v15  ;;  %v1827_v51 = vmul.f32 %v4853_v34, %v3953_v12  ;;  %v2034_v30 = vmul.f32 %v4330_v54, %v1866_v49  ;;  %v2035_v6 = vmul.f32 %v4330_v54, %v1867_v47 }
 0x1fd   : > { %2713 = vrcp.f32 %v1576_v0  ;;  %v2045_v29 = vmul.f32 %v1960_v31, %v1869_v22  ;;  %v4394_v32 = vadd.f32 %v2044_v14, %v1836_v24  ;;  %v2048_v4 = vmul.f32 %v1968_v58, %v1868_v17  ;;  %2139 = vxpose.xlu1.b32.cont [10/16] %v4294_v2, 128  ;;  %v1964_v15 = vpop.permute.xlu1 %1963 }
 0x1fe   : > { %v4397_v9 = vadd.f32 %v2034_v30, %v1826_v63  ;;  %v4399_v56 = vadd.f32 %v2035_v6, %v1827_v51  ;;  %v2049_v55 = vmul.f32 %v1968_v58, %v1869_v22  ;;  %v1830_v40 = vmul.f32 %v4854_v7, %v4852_v45 }
 0x1ff   : > { %v4403_v37 = vadd.f32 %v2045_v29, %v1837_v18  ;;  %v4406_v57 = vadd.f32 %v2048_v4, %v4855_v36  ;;  %v1831_v54 = vmul.f32 %v4854_v7, %v3953_v12  ;;  %v2038_v31 = vmul.f32 %v1948_v38, %v1866_v49  ;;  %2171 = vxpose.xlu0.b32.cont [10/16] %v4302_v41, 128  ;;  %v4858_v18 = vld [vmem:[#allocation43_spill] sm:$0xff]  ;;  %v4862_v7 = vld [vmem:[#allocation54_spill] sm:$0xff] }
 0x200   : > { %v2706_v2 = vpop.eup %2705  ;;  %v4412_v24 = vadd.f32 %v2049_v55, %v4856_v21  ;;  %v2039_v28 = vmul.f32 %v1948_v38, %v1867_v47  ;;  %v1582_v23 = vadd.f32 %v4857_v13, %v4153_v60  ;;  %v1583_v16 = vadd.f32 %v4858_v18, %v4227_v48  ;;  %v4861_v29 = vld [vmem:[#allocation51_spill] sm:$0xff] }
 0x201   : > { %v2708_v10 = vpop.eup %2707  ;;  %v4418_v11 = vadd.f32 %v2038_v31, %v1830_v40  ;;  %v1834_v12 = vmul.f32 %v4859_v39, %v4081_v3  ;;  %v1835_v41 = vmul.f32 %v4859_v39, %v4109_v20  ;;  %v2042_v49 = vmul.f32 %v1956_v43, %v1868_v17  ;;  %2140 = vxpose.xlu1.b32.cont [11/16] %v2086_v27, 128  ;;  %v4864_v21 = vld [vmem:[#allocation27_spill] sm:$0xff] }
 0x202   : > { %v1577_v0 = vadd.f32 %v2708_v10, %v2706_v2  ;;  %v4424_v47 = vadd.f32 %v2039_v28, %v1831_v54  ;;  %2715 = vrcp.f32 %v1582_v23  ;;  %v2043_v38 = vmul.f32 %v1956_v43, %v1869_v22  ;;  %v4863_v54 = vld [vmem:[#allocation25_spill] sm:$0xff] }
 0x203   : > { %2717 = vrcp.f32 %v1583_v16  ;;  %v4426_v26 = vadd.f32 %v2042_v49, %v1834_v12  ;;  %v1838_v58 = vmul.f32 %v4860_v1, %v4081_v3  ;;  %v1839_v14 = vmul.f32 %v4860_v1, %v4109_v20  ;;  %2172 = vxpose.xlu0.b32.cont [11/16] %v4359_v19, 128  ;;  %v1976_v3 = vpop.permute.xlu0 %1975 }
 0x204   : > { %2719 = vrcp.f32 %v1577_v0  ;;  %v4433_v45 = vadd.f32 %v2043_v38, %v1835_v41  ;;  %v2046_v27 = vmul.f32 %v1964_v15, %v1868_v17  ;;  %v2047_v34 = vmul.f32 %v1964_v15, %v1869_v22 }
 0x205   : > { %v4435_v63 = vpop.eup %2709  ;;  %v1584_v43 = vadd.f32 %v4372_v53, %v4366_v61  ;;  %2141 = vxpose.xlu1.b32.cont [12/16] %v4310_v5, 128  ;;  %v4451_v5 = vpop.permute.xlu1 %1971 }
 0x206   : > { %v4440_v51 = vpop.eup %2711  ;;  %v4442_v30 = vadd.f32 %v2046_v27, %v1838_v58  ;;  %v4444_v20 = vadd.f32 %v2047_v34, %v1839_v14  ;;  %v4865_v34 = vld [vmem:[#allocation9_spill] sm:$0xff] }
 0x207   : > { %v2714_v19 = vpop.eup %2713  ;;  %v1585_v6 = vadd.f32 %v4440_v51, %v4435_v63  ;;  %2173 = vxpose.xlu0.b32.cont [12/16] %v4312_v35, 128  ;;  %2721 = vrcp.f32 %v1584_v43  ;;  %v1984_v39 = vpop.permute.xlu0 %1983 }
 0x208   : > { %v1624_v17 = vmul.f32 %v2714_v19, %v4357_v59  ;;  %v1864_v22 = vmul.f32 %v2714_v19, %v4362_v8 }
 0x209   : > { %2723 = vrcp.f32 %v1585_v6  ;;  %v1980_v6 = vpop.permute.xlu1 %1979 }
 0x20a   : > { %v1820_v4 = vmul.f32 %v4861_v29, %v1624_v17  ;;  %v2028_v55 = vmul.f32 %v4268_v25, %v1864_v22  ;;  %v1824_v40 = vmul.f32 %v4862_v7, %v1624_v17  ;;  %v2032_v36 = vmul.f32 %v4298_v46, %v1864_v22 }
 0x20b   : > { %v1818_v31 = vmul.f32 %v4863_v54, %v1624_v17  ;;  %v2026_v35 = vmul.f32 %v4300_v52, %v1864_v22  ;;  %v1822_v59 = vmul.f32 %v4864_v21, %v1624_v17  ;;  %v2030_v8 = vmul.f32 %v4321_v44, %v1864_v22 }
 0x20c   : > { %v2716_v28 = vpop.eup %2715  ;;  %v2092_v23 = vadd.f32 %v2028_v55, %v1820_v4  ;;  %v4461_v16 = vadd.f32 %v2032_v36, %v1824_v40 }
 0x20d   : > { %v2718_v12 = vpop.eup %2717  ;;  %v2090_v41 = vadd.f32 %v2026_v35, %v1818_v31  ;;  %v2094_v49 = vadd.f32 %v2030_v8, %v1822_v59  ;;  %v1630_v15 = vmul.f32 %v2716_v28, %v4153_v60  ;;  %v4465_v0 = vmul.f32 %v2716_v28, %v4857_v13  ;;  %v4866_v13 = vld [vmem:[#allocation26_spill] sm:$0xff]  ;;  %v1992_v35 = vpop.permute.xlu0 %1991 }
 0x20e   : > { %v2720_v38 = vpop.eup %2719  ;;  %v1631_v1 = vmul.f32 %v2718_v12, %v4227_v48  ;;  %v4469_v58 = vmul.f32 %v2718_v12, %v4858_v18 }
 0x20f   : > { %v1625_v14 = vmul.f32 %v2720_v38, %v2706_v2  ;;  %v1865_v27 = vmul.f32 %v2720_v38, %v2708_v10  ;;  %v1844_v43 = vmul.f32 %v4865_v34, %v1630_v15  ;;  %v2052_v19 = vmul.f32 %v1976_v3, %v4465_v0  ;;  %2142 = vxpose.xlu1.b32.cont [13/16] %v2090_v41, 128  ;;  %v1988_v38 = vpop.permute.xlu1 %1987 }
 0x210   : > { %v1845_v17 = vmul.f32 %v4865_v34, %v1631_v1  ;;  %v2053_v60 = vmul.f32 %v1976_v3, %v4469_v58  ;;  %v1848_v22 = vmul.f32 %v4866_v13, %v1630_v15  ;;  %v1849_v4 = vmul.f32 %v4866_v13, %v1631_v1  ;;  %v4869_v13 = vld [vmem:[#allocation8_spill] sm:$0xff] }
 0x211   : > { %v1821_v48 = vmul.f32 %v4861_v29, %v1625_v14  ;;  %v2029_v18 = vmul.f32 %v4268_v25, %v1865_v27  ;;  %v1825_v2 = vmul.f32 %v4862_v7, %v1625_v14  ;;  %v2033_v10 = vmul.f32 %v4298_v46, %v1865_v27  ;;  %v2722_v55 = vpop.eup %2721 }
 0x212   : > { %v1819_v40 = vmul.f32 %v4863_v54, %v1625_v14  ;;  %v2027_v36 = vmul.f32 %v4300_v52, %v1865_v27  ;;  %v1823_v31 = vmul.f32 %v4864_v21, %v1625_v14  ;;  %v2031_v3 = vmul.f32 %v4321_v44, %v1865_v27 }
 0x213   : > { %v2724_v59 = vpop.eup %2723  ;;  %v2093_v8 = vadd.f32 %v2029_v18, %v1821_v48  ;;  %v2097_v28 = vadd.f32 %v2033_v10, %v1825_v2  ;;  %v4485_v29 = vadd.f32 %v2052_v19, %v1844_v43  ;;  %v4487_v25 = vadd.f32 %v2053_v60, %v1845_v17  ;;  %2143 = vxpose.xlu1.b32.cont [14/16] %v2092_v23, 128  ;;  %v4867_v23 = vld [vmem:[#allocation34_spill] sm:$0xff]  ;;  %v4868_v19 = vld [vmem:[#allocation15_spill] sm:$0xff]  ;;  %v2000_v60 = vpop.permute.xlu0 %1999 }
 0x214   : > { %v2091_v7 = vadd.f32 %v2027_v36, %v1819_v40  ;;  %v2095_v46 = vadd.f32 %v2031_v3, %v1823_v31  ;;  %v2056_v12 = vmul.f32 %v1984_v39, %v4465_v0  ;;  %v2057_v54 = vmul.f32 %v1984_v39, %v4469_v58  ;;  %v4870_v36 = vld [vmem:[#allocation35_spill] sm:$0xff] }
 0x215   : > { %v1632_v52 = vmul.f32 %v2722_v55, %v4366_v61  ;;  %v1633_v21 = vmul.f32 %v2724_v59, %v4435_v63  ;;  %v1872_v44 = vmul.f32 %v2722_v55, %v4372_v53  ;;  %v1873_v41 = vmul.f32 %v2724_v59, %v4440_v51 }
 0x216   : > { %v4495_v14 = vadd.f32 %v2056_v12, %v1848_v22  ;;  %v4497_v27 = vadd.f32 %v2057_v54, %v1849_v4  ;;  %v1842_v34 = vmul.f32 %v4867_v23, %v1630_v15  ;;  %v1843_v43 = vmul.f32 %v4867_v23, %v1631_v1  ;;  %2174 = vxpose.xlu0.b32.cont [13/16] %v2091_v7, 128  ;;  %v1996_v7 = vpop.permute.xlu1 %1995  ;;  %v4871_v12 = vld [vmem:[#allocation36_spill] sm:$0xff] }
 0x217   : > { %v1852_v39 = vmul.f32 %v4868_v19, %v1632_v52  ;;  %v1853_v61 = vmul.f32 %v4868_v19, %v1633_v21  ;;  %v2060_v17 = vmul.f32 %v1992_v35, %v1872_v44  ;;  %v2061_v63 = vmul.f32 %v1992_v35, %v1873_v41  ;;  %2144 = vxpose.xlu1.b32.cont [15/16] %v2094_v49, 128 }
 0x218   : > { %v2050_v53 = vmul.f32 %v4451_v5, %v4465_v0  ;;  %v2051_v51 = vmul.f32 %v4451_v5, %v4469_v58  ;;  %v1856_v22 = vmul.f32 %v4869_v13, %v1632_v52  ;;  %v1857_v4 = vmul.f32 %v4869_v13, %v1633_v21 }
 0x219   : > { %v2124_v48 = vadd.f32 %v2060_v17, %v1852_v39  ;;  %v2125_v18 = vadd.f32 %v2061_v63, %v1853_v61  ;;  %v2064_v2 = vmul.f32 %v2000_v60, %v1872_v44  ;;  %v2065_v10 = vmul.f32 %v2000_v60, %v1873_v41  ;;  %v4872_v39 = vld [vmem:[#allocation37_spill] sm:$0xff] }
 0x21a   : > { %v2114_v55 = vadd.f32 %v2050_v53, %v1842_v34  ;;  %v2115_v40 = vadd.f32 %v2051_v51, %v1843_v43  ;;  %v1846_v31 = vmul.f32 %v4870_v36, %v1630_v15  ;;  %v1847_v49 = vmul.f32 %v4870_v36, %v1631_v1  ;;  %2175 = vxpose.xlu0.b32.cont [14/16] %v2093_v8, 128 }
 0x21b   : > { %v2128_v3 = vadd.f32 %v2064_v2, %v1856_v22  ;;  %v2129_v35 = vadd.f32 %v2065_v10, %v1857_v4  ;;  %v2054_v5 = vmul.f32 %v1980_v6, %v4465_v0  ;;  %v2055_v59 = vmul.f32 %v1980_v6, %v4469_v58  ;;  %2145 = vxpose.xlu1.b32.end [16/16] %v4461_v16, 128 }
 0x21c   : > { %v1850_v54 = vmul.f32 %v4871_v12, %v1632_v52  ;;  %v1851_v23 = vmul.f32 %v4871_v12, %v1633_v21  ;;  %v2058_v34 = vmul.f32 %v1988_v38, %v1872_v44  ;;  %v2059_v43 = vmul.f32 %v1988_v38, %v1873_v41 }
 0x21d   : > { %v2118_v19 = vadd.f32 %v2054_v5, %v1846_v31  ;;  %v2119_v15 = vadd.f32 %v2055_v59, %v1847_v49  ;;  %v1854_v1 = vmul.f32 %v4872_v39, %v1632_v52  ;;  %v1855_v8 = vmul.f32 %v4872_v39, %v1633_v21 }
 0x21e   : > { %v2122_v61 = vadd.f32 %v2058_v34, %v1850_v54  ;;  %v2123_v17 = vadd.f32 %v2059_v43, %v1851_v23  ;;  %v2062_v0 = vmul.f32 %v1996_v7, %v1872_v44  ;;  %v2063_v63 = vmul.f32 %v1996_v7, %v1873_v41  ;;  %2176 = vxpose.xlu0.b32.cont [15/16] %v2095_v46, 128 }
 0x21f   : > { %2226 = vxpose.xlu1.b32.start [1/16] %v4399_v56, 128 }
 0x220   : > { %v2126_v16 = vadd.f32 %v2062_v0, %v1854_v1  ;;  %v2127_v58 = vadd.f32 %v2063_v63, %v1855_v8 }
 0x222   : > { %2177 = vxpose.xlu0.b32.end [16/16] %v2097_v28, 128 }
 0x223   : > { %2227 = vxpose.xlu1.b32.cont [2/16] %v4378_v42, 128 }
 0x226   : > { %2194 = vxpose.xlu0.b32.start [1/16] %v4397_v9, 128 }
 0x227   : > { %2228 = vxpose.xlu1.b32.cont [3/16] %v4424_v47, 128 }
 0x22a   : > { %2195 = vxpose.xlu0.b32.cont [2/16] %v4375_v50, 128 }
 0x22b   : > { %2229 = vxpose.xlu1.b32.cont [4/16] %v4384_v62, 128 }
 0x22e   : > { %2196 = vxpose.xlu0.b32.cont [3/16] %v4418_v11, 128 }
 0x22f   : > { %2230 = vxpose.xlu1.b32.cont [5/16] %v4433_v45, 128 }
 0x232   : > { %2197 = vxpose.xlu0.b32.cont [4/16] %v4381_v33, 128 }
 0x233   : > { %2231 = vxpose.xlu1.b32.cont [6/16] %v4403_v37, 128 }
 0x236   : > { %2198 = vxpose.xlu0.b32.cont [5/16] %v4426_v26, 128 }
 0x237   : > { %2232 = vxpose.xlu1.b32.cont [7/16] %v4444_v20, 128 }
 0x23a   : > { %2199 = vxpose.xlu0.b32.cont [6/16] %v4394_v32, 128 }
 0x23b   : > { %2233 = vxpose.xlu1.b32.cont [8/16] %v4412_v24, 128 }
 0x23e   : > { %2200 = vxpose.xlu0.b32.cont [7/16] %v4442_v30, 128 }
 0x23f   : > { %2234 = vxpose.xlu1.b32.cont [9/16] %v2115_v40, 128 }
 0x242   : > { %2201 = vxpose.xlu0.b32.cont [8/16] %v4406_v57, 128 }
 0x243   : > { %2235 = vxpose.xlu1.b32.cont [10/16] %v4487_v25, 128 }
 0x246   : > { %2202 = vxpose.xlu0.b32.cont [9/16] %v2114_v55, 128 }
 0x247   : > { %2236 = vxpose.xlu1.b32.cont [11/16] %v2119_v15, 128 }
 0x24a   : > { %2203 = vxpose.xlu0.b32.cont [10/16] %v4485_v29, 128 }
 0x24b   : > { %2237 = vxpose.xlu1.b32.cont [12/16] %v4497_v27, 128 }
 0x24e   : > { %2204 = vxpose.xlu0.b32.cont [11/16] %v2118_v19, 128 }
 0x24f   : > { %2238 = vxpose.xlu1.b32.cont [13/16] %v2123_v17, 128 }
 0x252   : > { %2205 = vxpose.xlu0.b32.cont [12/16] %v4495_v14, 128 }
 0x253   : > { %2239 = vxpose.xlu1.b32.cont [14/16] %v2125_v18, 128 }
 0x256   : > { %2206 = vxpose.xlu0.b32.cont [13/16] %v2122_v61, 128 }
 0x257   : > { %2240 = vxpose.xlu1.b32.cont [15/16] %v2127_v58, 128 }
 0x25a   : > { %2207 = vxpose.xlu0.b32.cont [14/16] %v2124_v48, 128 }
 0x25b   : > { %2241 = vxpose.xlu1.b32.end [16/16] %v2129_v35, 128 }
 0x25e   : > { %2208 = vxpose.xlu0.b32.cont [15/16] %v2126_v16, 128 }
 0x25f   : > { %v2146_v50 = vpop.trf.xlu1 }
 0x260   : > { %2258 = vst [vmem:[%s4540_s8] sm:$0xff] %v2146_v50 }
 0x262   : > { %2209 = vxpose.xlu0.b32.end [16/16] %v2128_v3, 128 }
 0x263   : > { %v2147_v42 = vpop.trf.xlu1 }
 0x264   : > { %2260 = vst [vmem:[%s4540_s8 + $0x10] sm:$0xff] %v2147_v42 }
 0x266   : > { %v2178_v33 = vpop.trf.xlu0 }
 0x267   : > { %2290 = vst [vmem:[%s4540_s8 + $0x100] sm:$0xff] %v2178_v33  ;;  %v2148_v62 = vpop.trf.xlu1 }
 0x268   : > { %2262 = vst [vmem:[%s4540_s8 + $0x20] sm:$0xff] %v2148_v62 }
 0x26a   : > { %v2179_v32 = vpop.trf.xlu0 }
 0x26b   : > { %2292 = vst [vmem:[%s4540_s8 + $0x110] sm:$0xff] %v2179_v32  ;;  %v2149_v9 = vpop.trf.xlu1 }
 0x26c   : > { %2264 = vst [vmem:[%s4540_s8 + $0x30] sm:$0xff] %v2149_v9 }
 0x26e   : > { %v2180_v56 = vpop.trf.xlu0 }
 0x26f   : > { %2294 = vst [vmem:[%s4540_s8 + $0x120] sm:$0xff] %v2180_v56  ;;  %v2150_v37 = vpop.trf.xlu1 }
 0x270   : > { %2266 = vst [vmem:[%s4540_s8 + $0x40] sm:$0xff] %v2150_v37 }
 0x272   : > { %v2181_v57 = vpop.trf.xlu0 }
 0x273   : > { %2296 = vst [vmem:[%s4540_s8 + $0x130] sm:$0xff] %v2181_v57  ;;  %v2151_v24 = vpop.trf.xlu1 }
 0x274   : > { %2268 = vst [vmem:[%s4540_s8 + $0x50] sm:$0xff] %v2151_v24 }
 0x276   : > { %v2182_v11 = vpop.trf.xlu0 }
 0x277   : > { %2298 = vst [vmem:[%s4540_s8 + $0x140] sm:$0xff] %v2182_v11  ;;  %v2152_v47 = vpop.trf.xlu1 }
 0x278   : > { %2270 = vst [vmem:[%s4540_s8 + $0x60] sm:$0xff] %v2152_v47 }
 0x27a   : > { %v2183_v26 = vpop.trf.xlu0 }
 0x27b   : > { %2300 = vst [vmem:[%s4540_s8 + $0x150] sm:$0xff] %v2183_v26  ;;  %v2153_v45 = vpop.trf.xlu1 }
 0x27c   : > { %2272 = vst [vmem:[%s4540_s8 + $0x70] sm:$0xff] %v2153_v45 }
 0x27e   : > { %v2184_v30 = vpop.trf.xlu0 }
 0x27f   : > { %2302 = vst [vmem:[%s4540_s8 + $0x160] sm:$0xff] %v2184_v30  ;;  %v2154_v20 = vpop.trf.xlu1 }
 0x280   : > { %2274 = vst [vmem:[%s4540_s8 + $0x80] sm:$0xff] %v2154_v20 }
 0x282   : > { %v2185_v6 = vpop.trf.xlu0 }
 0x283   : > { %2304 = vst [vmem:[%s4540_s8 + $0x170] sm:$0xff] %v2185_v6  ;;  %v2155_v28 = vpop.trf.xlu1 }
 0x284   : > { %2276 = vst [vmem:[%s4540_s8 + $0x90] sm:$0xff] %v2155_v28 }
 0x286   : > { %v2186_v29 = vpop.trf.xlu0 }
 0x287   : > { %2306 = vst [vmem:[%s4540_s8 + $0x180] sm:$0xff] %v2186_v29  ;;  %v2156_v25 = vpop.trf.xlu1 }
 0x288   : > { %2278 = vst [vmem:[%s4540_s8 + $0xa0] sm:$0xff] %v2156_v25 }
 0x28a   : > { %v2187_v46 = vpop.trf.xlu0 }
 0x28b   : > { %2308 = vst [vmem:[%s4540_s8 + $0x190] sm:$0xff] %v2187_v46  ;;  %v2157_v52 = vpop.trf.xlu1 }
 0x28c   : > { %2280 = vst [vmem:[%s4540_s8 + $0xb0] sm:$0xff] %v2157_v52 }
 0x28e   : > { %v2188_v21 = vpop.trf.xlu0 }
 0x28f   : > { %2310 = vst [vmem:[%s4540_s8 + $0x1a0] sm:$0xff] %v2188_v21  ;;  %v2158_v44 = vpop.trf.xlu1 }
 0x290   : > { %2282 = vst [vmem:[%s4540_s8 + $0xc0] sm:$0xff] %v2158_v44 }
 0x292   : > { %v2189_v41 = vpop.trf.xlu0 }
 0x293   : > { %2312 = vst [vmem:[%s4540_s8 + $0x1b0] sm:$0xff] %v2189_v41  ;;  %v2159_v38 = vpop.trf.xlu1 }
 0x294   : > { %2284 = vst [vmem:[%s4540_s8 + $0xd0] sm:$0xff] %v2159_v38 }
 0x296   : > { %v2190_v14 = vpop.trf.xlu0 }
 0x297   : > { %2314 = vst [vmem:[%s4540_s8 + $0x1c0] sm:$0xff] %v2190_v14  ;;  %v2160_v27 = vpop.trf.xlu1 }
 0x298   : > { %2286 = vst [vmem:[%s4540_s8 + $0xe0] sm:$0xff] %v2160_v27 }
 0x29a   : > { %v2191_v53 = vpop.trf.xlu0 }
 0x29b   : > { %2316 = vst [vmem:[%s4540_s8 + $0x1d0] sm:$0xff] %v2191_v53  ;;  %v2161_v51 = vpop.trf.xlu1 }
 0x29c   : > { %2288 = vst [vmem:[%s4540_s8 + $0xf0] sm:$0xff] %v2161_v51 }
 0x29e   : > { %v2192_v60 = vpop.trf.xlu0 }
 0x29f   : > { %2318 = vst [vmem:[%s4540_s8 + $0x1e0] sm:$0xff] %v2192_v60  ;;  %v2242_v13 = vpop.trf.xlu1 }
 0x2a0   : > { %2291 = vst [vmem:[%s4540_s8 + $0x108] sm:$0xff] %v2242_v13 }
 0x2a2   : > { %v2193_v22 = vpop.trf.xlu0 }
 0x2a3   : > { %2320 = vst [vmem:[%s4540_s8 + $0x1f0] sm:$0xff] %v2193_v22  ;;  %v2243_v4 = vpop.trf.xlu1 }
 0x2a4   : > { %2293 = vst [vmem:[%s4540_s8 + $0x118] sm:$0xff] %v2243_v4 }
 0x2a6   : > { %v2210_v48 = vpop.trf.xlu0 }
 0x2a7   : > { %2259 = vst [vmem:[%s4540_s8 + $0x8] sm:$0xff] %v2210_v48  ;;  %v2244_v18 = vpop.trf.xlu1 }
 0x2a8   : > { %2295 = vst [vmem:[%s4540_s8 + $0x128] sm:$0xff] %v2244_v18 }
 0x2aa   : > { %v2211_v2 = vpop.trf.xlu0 }
 0x2ab   : > { %2261 = vst [vmem:[%s4540_s8 + $0x18] sm:$0xff] %v2211_v2  ;;  %v2245_v10 = vpop.trf.xlu1 }
 0x2ac   : > { %2297 = vst [vmem:[%s4540_s8 + $0x138] sm:$0xff] %v2245_v10 }
 0x2ae   : > { %v2212_v55 = vpop.trf.xlu0 }
 0x2af   : > { %2263 = vst [vmem:[%s4540_s8 + $0x28] sm:$0xff] %v2212_v55  ;;  %v2246_v40 = vpop.trf.xlu1 }
 0x2b0   : > { %2299 = vst [vmem:[%s4540_s8 + $0x148] sm:$0xff] %v2246_v40 }
 0x2b2   : > { %v2213_v36 = vpop.trf.xlu0 }
 0x2b3   : > { %2265 = vst [vmem:[%s4540_s8 + $0x38] sm:$0xff] %v2213_v36  ;;  %v2247_v31 = vpop.trf.xlu1 }
 0x2b4   : > { %2301 = vst [vmem:[%s4540_s8 + $0x158] sm:$0xff] %v2247_v31 }
 0x2b6   : > { %v2214_v49 = vpop.trf.xlu0 }
 0x2b7   : > { %2267 = vst [vmem:[%s4540_s8 + $0x48] sm:$0xff] %v2214_v49  ;;  %v2248_v3 = vpop.trf.xlu1 }
 0x2b8   : > { %2303 = vst [vmem:[%s4540_s8 + $0x168] sm:$0xff] %v2248_v3 }
 0x2ba   : > { %v2215_v35 = vpop.trf.xlu0 }
 0x2bb   : > { %2269 = vst [vmem:[%s4540_s8 + $0x58] sm:$0xff] %v2215_v35  ;;  %v2249_v5 = vpop.trf.xlu1 }
 0x2bc   : > { %2305 = vst [vmem:[%s4540_s8 + $0x178] sm:$0xff] %v2249_v5 }
 0x2be   : > { %v2216_v59 = vpop.trf.xlu0 }
 0x2bf   : > { %2271 = vst [vmem:[%s4540_s8 + $0x68] sm:$0xff] %v2216_v59  ;;  %v2250_v7 = vpop.trf.xlu1 }
 0x2c0   : > { %2307 = vst [vmem:[%s4540_s8 + $0x188] sm:$0xff] %v2250_v7 }
 0x2c2   : > { %v2217_v12 = vpop.trf.xlu0 }
 0x2c3   : > { %2273 = vst [vmem:[%s4540_s8 + $0x78] sm:$0xff] %v2217_v12  ;;  %v2251_v54 = vpop.trf.xlu1 }
 0x2c4   : > { %2309 = vst [vmem:[%s4540_s8 + $0x198] sm:$0xff] %v2251_v54 }
 0x2c6   : > { %v2218_v23 = vpop.trf.xlu0 }
 0x2c7   : > { %2275 = vst [vmem:[%s4540_s8 + $0x88] sm:$0xff] %v2218_v23  ;;  %v2252_v34 = vpop.trf.xlu1 }
 0x2c8   : > { %2311 = vst [vmem:[%s4540_s8 + $0x1a8] sm:$0xff] %v2252_v34 }
 0x2ca   : > { %v2219_v43 = vpop.trf.xlu0 }
 0x2cb   : > { %2277 = vst [vmem:[%s4540_s8 + $0x98] sm:$0xff] %v2219_v43  ;;  %v2253_v19 = vpop.trf.xlu1 }
 0x2cc   : > { %2313 = vst [vmem:[%s4540_s8 + $0x1b8] sm:$0xff] %v2253_v19 }
 0x2ce   : > { %v2220_v15 = vpop.trf.xlu0 }
 0x2cf   : > { %2279 = vst [vmem:[%s4540_s8 + $0xa8] sm:$0xff] %v2220_v15  ;;  %v2254_v39 = vpop.trf.xlu1 }
 0x2d0   : > { %2315 = vst [vmem:[%s4540_s8 + $0x1c8] sm:$0xff] %v2254_v39 }
 0x2d2   : > { %v2221_v1 = vpop.trf.xlu0 }
 0x2d3   : > { %2281 = vst [vmem:[%s4540_s8 + $0xb8] sm:$0xff] %v2221_v1  ;;  %v2255_v8 = vpop.trf.xlu1 }
 0x2d4   : > { %2317 = vst [vmem:[%s4540_s8 + $0x1d8] sm:$0xff] %v2255_v8 }
 0x2d6   : > { %v2222_v61 = vpop.trf.xlu0 }
 0x2d7   : > { %2283 = vst [vmem:[%s4540_s8 + $0xc8] sm:$0xff] %v2222_v61  ;;  %v2256_v17 = vpop.trf.xlu1 }
 0x2d8   : > { %2319 = vst [vmem:[%s4540_s8 + $0x1e8] sm:$0xff] %v2256_v17 }
 0x2da   : > { %v2223_v0 = vpop.trf.xlu0 }
 0x2db   : > { %2285 = vst [vmem:[%s4540_s8 + $0xd8] sm:$0xff] %v2223_v0  ;;  %v2257_v63 = vpop.trf.xlu1 }
 0x2dc   : > { %2321 = vst [vmem:[%s4540_s8 + $0x1f8] sm:$0xff] %v2257_v63 }
 0x2de   : > { %v2224_v16 = vpop.trf.xlu0 }
 0x2df   : > { %2287 = vst [vmem:[%s4540_s8 + $0xe8] sm:$0xff] %v2224_v16 }
 0x2e2   : > { %v2225_v58 = vpop.trf.xlu0 }
 0x2e3   : > { %2289 = vst [vmem:[%s4540_s8 + $0xf8] sm:$0xff] %v2225_v58 }
 0x2e4   : > { %2768 = shalt.err (!%p2765_p5)
}
 0x2e5   : > { %s2769_s4 = scalar_lea.hbm %s4610_s22, 8192  ;;  %s2773_s7 = scalar_lea.hbm %s4665_s3, 16384 }
 0x2e6   : > { %p2770_p4 = scmp.ne.s32.totalorder %s4610_s22, %s2769_s4  ;;  %p2774_p12 = scmp.lt.u32.totalorder %s4610_s22, %s4665_s3 }
 0x2e7   : > { %p2775_p1 = scmp.lt.u32.totalorder %s2773_s7, %s2769_s4  ;;  %p2777_p8 = scmp.lt.u32.totalorder %s2769_s4, %s4610_s22 }
 0x2e8   : > { %p2771_p7 = pnand %p2770_p4, %p4873_p9 }
 0x2e9   : > { %p2776_p3 = por %p2775_p1, %p2774_p12 }
 0x2ea   : > { %p2772_p10 = pneg %p2771_p7 }
 0x2eb   : > { %p2778_p11 = por %p2777_p8, %p2776_p3 }
 0x2ed   : > { %p2779_p0 = pnand %p2778_p11, %p2772_p10 }
 0x2ef   : > { %2782 = shalt.err (!%p2779_p0)
}
 0x2f0   : > { %s2845_s8 = smov 256   ;;  %s2846_s18 = smov 16  }
 0x2f1   : > { %2509 = dma.vmem_to_hbm [thread:$0]  (%p4873_p9), %s4612_s24, 8192, %s4610_s22, %s2323_s23, %s2845_s8, %s2845_s8, %s2846_s18  }
 0x2f2 PF: > { %s2354_s9 = sand.u32 1, %s2817_s12   ;;  %p4874_p6 = scmp.ne.s32.totalorder %s4735_s27, 0 }
 0x2f3   : > { %p4875_p13 = scmp.ge.s32.totalorder %s2837_s17, 2  ;;  %s2355_s10 = scalar_lea.sflag [#allocation4], %s2354_s9 }
 0x2f5   : > { %p2516_p2 = pnand %p4875_p13, %p4874_p6 }
 0x2f7   : > { %2812 = dma.done.wait (!%p2516_p2), %s2355_s10, 8192  }
 0x2f8   : > { %2814 = vsyncadd (!%p2516_p2), %s2355_s10, 4294959104  ;;  %s19_s17 = sadd.s32 1, %s2837_s17   ;;  %s4876_s12 = smov %s2821_s13 }
 0x2f9   : > { %p16_p5 = scmp.ge.s32.totalorder %s19_s17, 4   ;;  %s4877_s13 = smov %s2825_s14 }
 0x2fa   : > { %s4878_s14 = smov %s2923_s26  ;;  %s4879_s15 = smov %s2833_s16 }
 0x2fb   : > { %s4880_s16 = smov %s4882_s20  ;;  %18 = sbr.rel (!%p16_p5) target bundleno = 6 (0x6), region = 77 }
 0x302   :  { %2360 = vsyncpa [#allocation3], 1 }
 0x303   :  { %2362 = vsyncpa [#allocation3 + $0x1], 1 }
 0x304   :  { %2363 = vsyncpa [#allocation4], 1 }
 0x305   :  { %2365 = vsyncpa [#allocation4 + $0x1], 1 }

</bundles_post_ra>
